<compile_context>
chip_gen: v7x
topology: tpu7x:2x2x1
jax: 0.10.0
libtpu: 0.0.40
codegen_flags: <defaults>
</compile_context>

<pallas_src>
import jax
import jax.numpy as jnp
from jax import lax
from jax.experimental import pallas as pl
from jax.experimental.pallas import tpu as pltpu


def _round_up(x, m):
    return (x + m - 1) // m * m


def _tpu_vmem_and_cores():
    """Best-effort query of per-core VMEM bytes and TensorCore count."""
    vmem_bytes = 64 * 1024 * 1024      # conservative fallback (v7x per-TC VMEM)
    num_cores = 1                      # conservative: no cross-core batch split
    try:
        info = pltpu.get_tpu_info()
        try:
            v = int(getattr(info, "vmem_capacity_bytes", 0) or 0)
            if v > 0:
                vmem_bytes = v
        except (TypeError, ValueError):
            pass
        for attr in ("num_cores", "core_count", "num_tensorcores",
                     "tensorcores_per_chip"):
            c = getattr(info, attr, None)
            try:
                c = int(c)
            except (TypeError, ValueError):
                continue
            if c > 0:
                num_cores = c
                break
    except Exception:
        pass
    return vmem_bytes, num_cores


def _gru_recurrence_pallas(gi, whh_t, bhn, *, seq_len, batch, h_pad):
    """Serial GRU recurrence over gate-aligned input-side pre-activations.

    gi:    (S, B, 3*h_pad) bf16  -- x @ W_ih^T + b_ih (+ folded b_hr, b_hz),
                                    time-major, PyTorch gate order [r, z, n],
                                    each gate zero-padded to h_pad lanes.
    whh_t: (h_pad, 3*h_pad) bf16 -- per-gate padded W_hh^T.
    bhn:   (1, h_pad) f32        -- b_hn (cannot be folded into gi).
    Returns (output (S, B, h_pad) bf16, h_final (B, h_pad) f32), trimmed in S/B.
    """
    S, B, H_pad = seq_len, batch, h_pad

    vmem_bytes, num_tc = _tpu_vmem_and_cores()
    usable = int(vmem_bytes * 0.85)           # headroom for Mosaic internals

    # ---- batch tiling: only split across cores when both halves stay fat ----
    B_pad = _round_up(B, 8)
    num_b, b_tile = 1, B_pad
    if num_tc >= 2 and B_pad >= 128:          # >=64 rows per TensorCore
        B_pad = _round_up(B_pad, 16)
        num_b, b_tile = 2, B_pad // 2

    # ---- time tiling from a footprint-derived VMEM budget --------------------
    whh_bytes = H_pad * 3 * H_pad * 2                    # bf16, single-buffered
    bhn_bytes = H_pad * 4
    hfin_bytes = 2 * b_tile * H_pad * 4                  # small double-buffered out
    scratch_bytes = b_tile * H_pad * 4
    const_bytes = whh_bytes + bhn_bytes + hfin_bytes + scratch_bytes
    per_t_bytes = 2 * b_tile * (3 * H_pad + H_pad) * 2   # gi + out blocks, bf16, 2x buf
    t_budget = (usable - const_bytes - (6 << 20)) // per_t_bytes
    T = int(max(1, min(S, 64, t_budget)))
    # Prefer a T that divides S so no padded-timestep masking is ever executed.
    if S % T != 0:
        div = 1
        for cand in range(T, 0, -1):
            if S % cand == 0:
                div = cand
                break
        if 2 * div >= T:
            T = div
    S_pad = _round_up(S, T)
    num_t = S_pad // T
    mask_tail = S_pad != S

    # Full unroll for small working sets; partial unroll to avoid vreg spills
    # when b_tile * H_pad is large.
    tile_vregs = max(1, b_tile // 8) * max(1, H_pad // 128)
    unroll = True if tile_vregs <= 8 else min(8, T)

    gi_p = jnp.pad(gi, ((0, S_pad - S), (0, B_pad - B), (0, 0)))

    def gru_kernel(gi_ref, whh_ref, bhn_ref, out_ref, hfin_ref, h_scratch):
        t_blk = pl.program_id(1)

        @pl.when(t_blk == 0)
        def _init():
            h_scratch[...] = jnp.zeros_like(h_scratch)

        whh = whh_ref[...]                     # (H_pad, 3*H_pad) bf16, resident
        bhn_b = bhn_ref[...]                   # (1, H_pad) f32

        # TODO(synk): for small H the stationary W_hh^T could be held in MXU
        # weight staging (pltpu.matmul_push_rhs once per grid step,
        # matmul_acc_lhs/pop per timestep) instead of re-issuing jnp.dot every
        # step; kept as jnp.dot for robustness.
        def step(i, carry):
            h_prev, h_prev_bf = carry
            gi_t = gi_ref[i].astype(jnp.float32)               # (b_tile, 3*H_pad)
            gh = jnp.dot(h_prev_bf, whh, preferred_element_type=jnp.float32)
            i_r = gi_t[:, 0:H_pad]
            i_z = gi_t[:, H_pad:2 * H_pad]
            i_n = gi_t[:, 2 * H_pad:3 * H_pad]
            h_r = gh[:, 0:H_pad]
            h_z = gh[:, H_pad:2 * H_pad]
            h_n = gh[:, 2 * H_pad:3 * H_pad] + bhn_b
            # sigmoid(x) == 0.5*(1 + tanh(0.5*x)): one EUP op per gate.
            r = 0.5 * (1.0 + jnp.tanh(0.5 * (i_r + h_r)))
            z = 0.5 * (1.0 + jnp.tanh(0.5 * (i_z + h_z)))
            n = jnp.tanh(i_n + r * h_n)
            h_new = n + z * (h_prev - n)       # == (1 - z) * n + z * h_prev
            if mask_tail:
                # Only compiled in when T does not divide S (rare after the
                # divisor-preferring T selection above).
                h_new = jnp.where(t_blk * T + i < S, h_new, h_prev)
            h_new_bf = h_new.astype(jnp.bfloat16)
            out_ref[i] = h_new_bf              # bf16 sequence writeback
            return h_new, h_new_bf             # reuse the bf16 cast as next LHS

        h0 = h_scratch[...]
        h_last, _ = lax.fori_loop(0, T, step, (h0, h0.astype(jnp.bfloat16)),
                                  unroll=unroll)
        h_scratch[...] = h_last

        # Final hidden is resident across the time axis: write it once.
        @pl.when(t_blk == pl.num_programs(1) - 1)
        def _final():
            hfin_ref[...] = h_last.astype(hfin_ref.dtype)

    footprint = const_bytes + per_t_bytes * T
    vmem_limit = int(min(usable, max(footprint + (8 << 20), 32 << 20)))

    out_p, hfin_p = pl.pallas_call(
        gru_kernel,
        out_shape=(
            jax.ShapeDtypeStruct((S_pad, B_pad, H_pad), jnp.bfloat16),
            jax.ShapeDtypeStruct((B_pad, H_pad), jnp.float32),
        ),
        grid_spec=pltpu.PrefetchScalarGridSpec(
            num_scalar_prefetch=0,
            grid=(num_b, num_t),
            in_specs=[
                # Streamed input pre-activations (double-buffered by Pallas).
                pl.BlockSpec((T, b_tile, 3 * H_pad), lambda b, t: (t, b, 0)),
                # Constant operands: whole-array VMEM residents (single copy,
                # no per-step DMA, no double buffer).
                pl.BlockSpec(memory_space=pltpu.MemorySpace.VMEM),
                pl.BlockSpec(memory_space=pltpu.MemorySpace.VMEM),
            ],
            out_specs=[
                pl.BlockSpec((T, b_tile, H_pad), lambda b, t: (t, b, 0)),
                pl.BlockSpec((b_tile, H_pad), lambda b, t: (b, 0)),
            ],
            scratch_shapes=[pltpu.VMEM((b_tile, H_pad), jnp.float32)],
        ),
        compiler_params=pltpu.CompilerParams(
            dimension_semantics=("parallel", "arbitrary"),
            vmem_limit_bytes=vmem_limit,
        ),
    )(gi_p, whh_t, bhn)

    return out_p[:S, :B], hfin_p[:B]


def encoder_rnn_forward(tokens, embedding, w_ih, w_hh, b_ih, b_hh):
    """tokens: (B, S) int32.  Returns (output (B, S, H) f32, h_n (1, B, H) f32)."""
    H = embedding.shape[1]
    H_pad = _round_up(H, 128)

    # --- per-gate padded parameters (O(H^2) work; keeps the big activation
    # --- un-reshaped and born with 128-lane-aligned gate blocks) --------------
    wih3 = jnp.pad(w_ih.reshape(3, H, H), ((0, 0), (0, H_pad - H), (0, 0)))
    wih_t = jnp.transpose(wih3, (2, 0, 1)).reshape(H, 3 * H_pad)        # (H, 3*H_pad)

    bih3 = b_ih.reshape(3, H)
    bhh3 = b_hh.reshape(3, H)
    # Fold b_hr / b_hz into the hoisted projection; b_hn must stay in-kernel
    # because PyTorch applies it inside r * (W_hn h + b_hn).
    bias3 = jnp.concatenate([bih3[:2] + bhh3[:2], bih3[2:]], axis=0)    # (3, H)
    gi_bias = jnp.pad(bias3, ((0, 0), (0, H_pad - H))).reshape(3 * H_pad)
    bhn = jnp.pad(bhh3[2], (0, H_pad - H)).reshape(1, H_pad).astype(jnp.float32)

    whh3 = jnp.transpose(w_hh.reshape(3, H, H), (0, 2, 1))              # (3, H_in, H_out)
    whh3 = jnp.pad(whh3, ((0, 0), (0, H_pad - H), (0, H_pad - H)))
    whh_t = jnp.transpose(whh3, (1, 0, 2)).reshape(H_pad, 3 * H_pad)
    whh_t = whh_t.astype(jnp.bfloat16)

    # --- embedding gather directly in time-major order + hoisted projection ---
    x_tm = jnp.take(embedding, tokens.T, axis=0)                        # (S, B, H)
    gi = jnp.dot(x_tm.astype(jnp.bfloat16), wih_t.astype(jnp.bfloat16),
                 preferred_element_type=jnp.float32) + gi_bias          # (S, B, 3*H_pad)
    gi = gi.astype(jnp.bfloat16)

    out_tm, h_fin = _gru_recurrence_pallas(gi, whh_t, bhn,
                                           seq_len=x_tm.shape[0],
                                           batch=x_tm.shape[1],
                                           h_pad=H_pad)

    # TODO(synk): the (S,B,H)->(B,S,H) transpose is an extra HBM pass; keep the
    # downstream consumer time-major if possible.  Done here in bf16 (half bytes).
    output = jnp.transpose(out_tm[:, :, :H], (1, 0, 2)).astype(jnp.float32)
    return output, h_fin[None, :, :H].astype(jnp.float32)


def _reference_gru(x_emb, w_ih, w_hh, b_ih, b_hh):
    """Pure-JAX f32 reference (PyTorch GRU semantics, batch_first)."""
    B, S, H = x_emb.shape
    h0 = jnp.zeros((B, H), jnp.float32)

    def step(h, x_t):
        gi = x_t @ w_ih.T + b_ih
        gh = h @ w_hh.T + b_hh
        i_r, i_z, i_n = gi[:, :H], gi[:, H:2 * H], gi[:, 2 * H:]
        h_r, h_z, h_n = gh[:, :H], gh[:, H:2 * H], gh[:, 2 * H:]
        r = jax.nn.sigmoid(i_r + h_r)
        z = jax.nn.sigmoid(i_z + h_z)
        n = jnp.tanh(i_n + r * h_n)
        h_new = (1.0 - z) * n + z * h
        return h_new, h_new

    h_last, ys = lax.scan(step, h0, jnp.transpose(x_emb, (1, 0, 2)))
    return jnp.transpose(ys, (1, 0, 2)), h_last[None]


if __name__ == "__main__":
    B, S, H, VOCAB = 2, 8, 32, 20

    key = jax.random.PRNGKey(0)
    k_tok, k_emb, k_wih, k_whh, k_bih, k_bhh = jax.random.split(key, 6)

    tokens = jax.random.randint(k_tok, (B, S), 0, VOCAB, dtype=jnp.int32)

    # Deterministic parameter init mirroring PyTorch shapes:
    #   embedding: (VOCAB, H) ~ N(0, 1)
    #   GRU weights/biases: uniform(-1/sqrt(H), 1/sqrt(H)), gate order [r, z, n]
    bound = 1.0 / (H ** 0.5)
    embedding = jax.random.normal(k_emb, (VOCAB, H), jnp.float32)
    w_ih = jax.random.uniform(k_wih, (3 * H, H), jnp.float32, -bound, bound)
    w_hh = jax.random.uniform(k_whh, (3 * H, H), jnp.float32, -bound, bound)
    b_ih = jax.random.uniform(k_bih, (3 * H,), jnp.float32, -bound, bound)
    b_hh = jax.random.uniform(k_bhh, (3 * H,), jnp.float32, -bound, bound)

    output, h_n = jax.jit(encoder_rnn_forward)(tokens, embedding, w_ih, w_hh,
                                               b_ih, b_hh)
    jax.block_until_ready((output, h_n))

    assert output.shape == (B, S, H)
    assert h_n.shape == (1, B, H)

    # Correctness check against a pure-JAX f32 reference (tolerance sized for
    # the bf16-input / f32-accumulate MXU path and bf16 sequence writeback).
    x_emb = jnp.take(embedding, tokens, axis=0)
    ref_out, ref_h = _reference_gru(x_emb, w_ih, w_hh, b_ih, b_hh)
    assert jnp.allclose(output, ref_out, rtol=3e-2, atol=3e-2)
    assert jnp.allclose(h_n, ref_h, rtol=3e-2, atol=3e-2)

    print("KERNEL_OK")
</pallas_src>

<mosaic_0001>
module attributes {stable_mosaic.version = 11 : i64} {
  func.func @gru_kernel(%arg0: i32, %arg1: i32, %arg2: memref<8x8x384xbf16, #tpu.memory_space<vmem>>, %arg3: memref<128x384xbf16, #tpu.memory_space<vmem>>, %arg4: memref<1x128xf32, #tpu.memory_space<vmem>>, %arg5: memref<8x8x128xbf16, #tpu.memory_space<vmem>>, %arg6: memref<8x128xf32, #tpu.memory_space<vmem>>, %arg7: memref<8x128xf32, #tpu.memory_space<vmem>>) attributes {dimension_semantics = [#tpu.dimension_semantics<parallel>, #tpu.dimension_semantics<arbitrary>], iteration_bounds = array<i64: 1, 1>, scalar_prefetch = 0 : i64, scratch_operands = 1 : i64, tpu.core_type = #tpu.core_type<tc>, window_params = [{transform_indices = @transform_0, window_bounds = array<i64: 8, 8, 384>}, {pipeline_mode = #tpu.pipeline_mode<synchronous>, transform_indices = @transform_1, window_bounds = array<i64: 128, 384>}, {pipeline_mode = #tpu.pipeline_mode<synchronous>, transform_indices = @transform_2, window_bounds = array<i64: 1, 128>}, {transform_indices = @transform_3, window_bounds = array<i64: 8, 8, 128>}, {transform_indices = @transform_4, window_bounds = array<i64: 8, 128>}]} {
    %c0_i32 = arith.constant 0 : i32
    %0 = arith.cmpi eq, %arg1, %c0_i32 : i32
    %1 = arith.extui %0 : i1 to i32
    %c0_i32_0 = arith.constant 0 : i32
    %2 = arith.cmpi ne, %1, %c0_i32_0 : i32
    scf.if %2 {
      %cst_98 = arith.constant 0.000000e+00 : f32
      %331 = vector.broadcast %cst_98 : f32 to vector<8x128xf32>
      %c0_99 = arith.constant 0 : index
      %c0_100 = arith.constant 0 : index
      %332 = vector.load %arg7[%c0_99, %c0_100] : memref<8x128xf32, #tpu.memory_space<vmem>>, vector<8x128xf32>
      tpu.vector_store %arg7[%c0_99, %c0_100], %331 {strides = array<i32>} : memref<8x128xf32, #tpu.memory_space<vmem>>, vector<8x128xf32>,
    } else {
    }
    %c0 = arith.constant 0 : index
    %c0_1 = arith.constant 0 : index
    %3 = vector.load %arg3[%c0, %c0_1] : memref<128x384xbf16, #tpu.memory_space<vmem>>, vector<128x384xbf16>
    %c0_2 = arith.constant 0 : index
    %c0_3 = arith.constant 0 : index
    %4 = vector.load %arg4[%c0_2, %c0_3] : memref<1x128xf32, #tpu.memory_space<vmem>>, vector<1x128xf32>
    %c0_4 = arith.constant 0 : index
    %c0_5 = arith.constant 0 : index
    %5 = vector.load %arg7[%c0_4, %c0_5] : memref<8x128xf32, #tpu.memory_space<vmem>>, vector<8x128xf32>
    %6 = arith.truncf %5 : vector<8x128xf32> to vector<8x128xbf16>
    %c0_i32_6 = arith.constant 0 : i32
    %7 = arith.index_cast %c0_i32_6 : i32 to index
    %c0_7 = arith.constant 0 : index
    %c0_8 = arith.constant 0 : index
    %8 = vector.load %arg2[%7, %c0_7, %c0_8] : memref<8x8x384xbf16, #tpu.memory_space<vmem>>, vector<1x8x384xbf16>
    %9 = vector.shape_cast %8 : vector<1x8x384xbf16> to vector<8x384xbf16>
    %10 = arith.extf %9 : vector<8x384xbf16> to vector<8x384xf32>
    %cst = arith.constant dense<0.000000e+00> : vector<8x384xf32>
    %11 = tpu.matmul %6, %3, %cst {dimension_numbers = #tpu.dot_dimension_numbers<[1], [0], [0], [1], [0, 0, 1, 1], [], []>} : vector<8x128xbf16>, vector<128x384xbf16>, vector<8x384xf32> -> vector<8x384xf32>
    %12 = vector.extract_strided_slice %10 {offsets = [0, 0], sizes = [8, 128], strides = [1, 1]} : vector<8x384xf32> to vector<8x128xf32>
    %13 = vector.extract_strided_slice %10 {offsets = [0, 128], sizes = [8, 128], strides = [1, 1]} : vector<8x384xf32> to vector<8x128xf32>
    %14 = vector.extract_strided_slice %10 {offsets = [0, 256], sizes = [8, 128], strides = [1, 1]} : vector<8x384xf32> to vector<8x128xf32>
    %15 = vector.extract_strided_slice %11 {offsets = [0, 0], sizes = [8, 128], strides = [1, 1]} : vector<8x384xf32> to vector<8x128xf32>
    %16 = vector.extract_strided_slice %11 {offsets = [0, 128], sizes = [8, 128], strides = [1, 1]} : vector<8x384xf32> to vector<8x128xf32>
    %17 = vector.extract_strided_slice %11 {offsets = [0, 256], sizes = [8, 128], strides = [1, 1]} : vector<8x384xf32> to vector<8x128xf32>
    %18 = vector.broadcast %4 : vector<1x128xf32> to vector<8x128xf32>
    %19 = arith.addf %17, %18 : vector<8x128xf32>
    %20 = arith.addf %12, %15 : vector<8x128xf32>
    %cst_9 = arith.constant 5.000000e-01 : f32
    %21 = vector.broadcast %cst_9 : f32 to vector<8x128xf32>
    %22 = arith.mulf %21, %20 : vector<8x128xf32>
    %23 = math.tanh %22 : vector<8x128xf32>
    %cst_10 = arith.constant 1.000000e+00 : f32
    %24 = vector.broadcast %cst_10 : f32 to vector<8x128xf32>
    %25 = arith.addf %24, %23 : vector<8x128xf32>
    %cst_11 = arith.constant 5.000000e-01 : f32
    %26 = vector.broadcast %cst_11 : f32 to vector<8x128xf32>
    %27 = arith.mulf %26, %25 : vector<8x128xf32>
    %28 = arith.addf %13, %16 : vector<8x128xf32>
    %cst_12 = arith.constant 5.000000e-01 : f32
    %29 = vector.broadcast %cst_12 : f32 to vector<8x128xf32>
    %30 = arith.mulf %29, %28 : vector<8x128xf32>
    %31 = math.tanh %30 : vector<8x128xf32>
    %cst_13 = arith.constant 1.000000e+00 : f32
    %32 = vector.broadcast %cst_13 : f32 to vector<8x128xf32>
    %33 = arith.addf %32, %31 : vector<8x128xf32>
    %cst_14 = arith.constant 5.000000e-01 : f32
    %34 = vector.broadcast %cst_14 : f32 to vector<8x128xf32>
    %35 = arith.mulf %34, %33 : vector<8x128xf32>
    %36 = arith.mulf %27, %19 : vector<8x128xf32>
    %37 = arith.addf %14, %36 : vector<8x128xf32>
    %38 = math.tanh %37 : vector<8x128xf32>
    %39 = arith.subf %5, %38 : vector<8x128xf32>
    %40 = arith.mulf %35, %39 : vector<8x128xf32>
    %41 = arith.addf %38, %40 : vector<8x128xf32>
    %42 = arith.truncf %41 : vector<8x128xf32> to vector<8x128xbf16>
    %43 = arith.index_cast %c0_i32_6 : i32 to index
    %c0_15 = arith.constant 0 : index
    %c0_16 = arith.constant 0 : index
    %44 = vector.load %arg5[%43, %c0_15, %c0_16] : memref<8x8x128xbf16, #tpu.memory_space<vmem>>, vector<1x8x128xbf16>
    %45 = vector.shape_cast %44 : vector<1x8x128xbf16> to vector<8x128xbf16>
    %46 = vector.shape_cast %42 : vector<8x128xbf16> to vector<1x8x128xbf16>
    tpu.vector_store %arg5[%43, %c0_15, %c0_16], %46 {strides = array<i32>} : memref<8x8x128xbf16, #tpu.memory_space<vmem>>, vector<1x8x128xbf16>,
    %c1_i32 = arith.constant 1 : i32
    %47 = arith.index_cast %c1_i32 : i32 to index
    %c0_17 = arith.constant 0 : index
    %c0_18 = arith.constant 0 : index
    %48 = vector.load %arg2[%47, %c0_17, %c0_18] : memref<8x8x384xbf16, #tpu.memory_space<vmem>>, vector<1x8x384xbf16>
    %49 = vector.shape_cast %48 : vector<1x8x384xbf16> to vector<8x384xbf16>
    %50 = arith.extf %49 : vector<8x384xbf16> to vector<8x384xf32>
    %cst_19 = arith.constant dense<0.000000e+00> : vector<8x384xf32>
    %51 = tpu.matmul %42, %3, %cst_19 {dimension_numbers = #tpu.dot_dimension_numbers<[1], [0], [0], [1], [0, 0, 1, 1], [], []>} : vector<8x128xbf16>, vector<128x384xbf16>, vector<8x384xf32> -> vector<8x384xf32>
    %52 = vector.extract_strided_slice %50 {offsets = [0, 0], sizes = [8, 128], strides = [1, 1]} : vector<8x384xf32> to vector<8x128xf32>
    %53 = vector.extract_strided_slice %50 {offsets = [0, 128], sizes = [8, 128], strides = [1, 1]} : vector<8x384xf32> to vector<8x128xf32>
    %54 = vector.extract_strided_slice %50 {offsets = [0, 256], sizes = [8, 128], strides = [1, 1]} : vector<8x384xf32> to vector<8x128xf32>
    %55 = vector.extract_strided_slice %51 {offsets = [0, 0], sizes = [8, 128], strides = [1, 1]} : vector<8x384xf32> to vector<8x128xf32>
    %56 = vector.extract_strided_slice %51 {offsets = [0, 128], sizes = [8, 128], strides = [1, 1]} : vector<8x384xf32> to vector<8x128xf32>
    %57 = vector.extract_strided_slice %51 {offsets = [0, 256], sizes = [8, 128], strides = [1, 1]} : vector<8x384xf32> to vector<8x128xf32>
    %58 = vector.broadcast %4 : vector<1x128xf32> to vector<8x128xf32>
    %59 = arith.addf %57, %58 : vector<8x128xf32>
    %60 = arith.addf %52, %55 : vector<8x128xf32>
    %cst_20 = arith.constant 5.000000e-01 : f32
    %61 = vector.broadcast %cst_20 : f32 to vector<8x128xf32>
    %62 = arith.mulf %61, %60 : vector<8x128xf32>
    %63 = math.tanh %62 : vector<8x128xf32>
    %cst_21 = arith.constant 1.000000e+00 : f32
    %64 = vector.broadcast %cst_21 : f32 to vector<8x128xf32>
    %65 = arith.addf %64, %63 : vector<8x128xf32>
    %cst_22 = arith.constant 5.000000e-01 : f32
    %66 = vector.broadcast %cst_22 : f32 to vector<8x128xf32>
    %67 = arith.mulf %66, %65 : vector<8x128xf32>
    %68 = arith.addf %53, %56 : vector<8x128xf32>
    %cst_23 = arith.constant 5.000000e-01 : f32
    %69 = vector.broadcast %cst_23 : f32 to vector<8x128xf32>
    %70 = arith.mulf %69, %68 : vector<8x128xf32>
    %71 = math.tanh %70 : vector<8x128xf32>
    %cst_24 = arith.constant 1.000000e+00 : f32
    %72 = vector.broadcast %cst_24 : f32 to vector<8x128xf32>
    %73 = arith.addf %72, %71 : vector<8x128xf32>
    %cst_25 = arith.constant 5.000000e-01 : f32
    %74 = vector.broadcast %cst_25 : f32 to vector<8x128xf32>
    %75 = arith.mulf %74, %73 : vector<8x128xf32>
    %76 = arith.mulf %67, %59 : vector<8x128xf32>
    %77 = arith.addf %54, %76 : vector<8x128xf32>
    %78 = math.tanh %77 : vector<8x128xf32>
    %79 = arith.subf %41, %78 : vector<8x128xf32>
    %80 = arith.mulf %75, %79 : vector<8x128xf32>
    %81 = arith.addf %78, %80 : vector<8x128xf32>
    %82 = arith.truncf %81 : vector<8x128xf32> to vector<8x128xbf16>
    %83 = arith.index_cast %c1_i32 : i32 to index
    %c0_26 = arith.constant 0 : index
    %c0_27 = arith.constant 0 : index
    %84 = vector.load %arg5[%83, %c0_26, %c0_27] : memref<8x8x128xbf16, #tpu.memory_space<vmem>>, vector<1x8x128xbf16>
    %85 = vector.shape_cast %84 : vector<1x8x128xbf16> to vector<8x128xbf16>
    %86 = vector.shape_cast %82 : vector<8x128xbf16> to vector<1x8x128xbf16>
    tpu.vector_store %arg5[%83, %c0_26, %c0_27], %86 {strides = array<i32>} : memref<8x8x128xbf16, #tpu.memory_space<vmem>>, vector<1x8x128xbf16>,
    %c2_i32 = arith.constant 2 : i32
    %87 = arith.index_cast %c2_i32 : i32 to index
    %c0_28 = arith.constant 0 : index
    %c0_29 = arith.constant 0 : index
    %88 = vector.load %arg2[%87, %c0_28, %c0_29] : memref<8x8x384xbf16, #tpu.memory_space<vmem>>, vector<1x8x384xbf16>
    %89 = vector.shape_cast %88 : vector<1x8x384xbf16> to vector<8x384xbf16>
    %90 = arith.extf %89 : vector<8x384xbf16> to vector<8x384xf32>
    %cst_30 = arith.constant dense<0.000000e+00> : vector<8x384xf32>
    %91 = tpu.matmul %82, %3, %cst_30 {dimension_numbers = #tpu.dot_dimension_numbers<[1], [0], [0], [1], [0, 0, 1, 1], [], []>} : vector<8x128xbf16>, vector<128x384xbf16>, vector<8x384xf32> -> vector<8x384xf32>
    %92 = vector.extract_strided_slice %90 {offsets = [0, 0], sizes = [8, 128], strides = [1, 1]} : vector<8x384xf32> to vector<8x128xf32>
    %93 = vector.extract_strided_slice %90 {offsets = [0, 128], sizes = [8, 128], strides = [1, 1]} : vector<8x384xf32> to vector<8x128xf32>
    %94 = vector.extract_strided_slice %90 {offsets = [0, 256], sizes = [8, 128], strides = [1, 1]} : vector<8x384xf32> to vector<8x128xf32>
    %95 = vector.extract_strided_slice %91 {offsets = [0, 0], sizes = [8, 128], strides = [1, 1]} : vector<8x384xf32> to vector<8x128xf32>
    %96 = vector.extract_strided_slice %91 {offsets = [0, 128], sizes = [8, 128], strides = [1, 1]} : vector<8x384xf32> to vector<8x128xf32>
    %97 = vector.extract_strided_slice %91 {offsets = [0, 256], sizes = [8, 128], strides = [1, 1]} : vector<8x384xf32> to vector<8x128xf32>
    %98 = vector.broadcast %4 : vector<1x128xf32> to vector<8x128xf32>
    %99 = arith.addf %97, %98 : vector<8x128xf32>
    %100 = arith.addf %92, %95 : vector<8x128xf32>
    %cst_31 = arith.constant 5.000000e-01 : f32
    %101 = vector.broadcast %cst_31 : f32 to vector<8x128xf32>
    %102 = arith.mulf %101, %100 : vector<8x128xf32>
    %103 = math.tanh %102 : vector<8x128xf32>
    %cst_32 = arith.constant 1.000000e+00 : f32
    %104 = vector.broadcast %cst_32 : f32 to vector<8x128xf32>
    %105 = arith.addf %104, %103 : vector<8x128xf32>
    %cst_33 = arith.constant 5.000000e-01 : f32
    %106 = vector.broadcast %cst_33 : f32 to vector<8x128xf32>
    %107 = arith.mulf %106, %105 : vector<8x128xf32>
    %108 = arith.addf %93, %96 : vector<8x128xf32>
    %cst_34 = arith.constant 5.000000e-01 : f32
    %109 = vector.broadcast %cst_34 : f32 to vector<8x128xf32>
    %110 = arith.mulf %109, %108 : vector<8x128xf32>
    %111 = math.tanh %110 : vector<8x128xf32>
    %cst_35 = arith.constant 1.000000e+00 : f32
    %112 = vector.broadcast %cst_35 : f32 to vector<8x128xf32>
    %113 = arith.addf %112, %111 : vector<8x128xf32>
    %cst_36 = arith.constant 5.000000e-01 : f32
    %114 = vector.broadcast %cst_36 : f32 to vector<8x128xf32>
    %115 = arith.mulf %114, %113 : vector<8x128xf32>
    %116 = arith.mulf %107, %99 : vector<8x128xf32>
    %117 = arith.addf %94, %116 : vector<8x128xf32>
    %118 = math.tanh %117 : vector<8x128xf32>
    %119 = arith.subf %81, %118 : vector<8x128xf32>
    %120 = arith.mulf %115, %119 : vector<8x128xf32>
    %121 = arith.addf %118, %120 : vector<8x128xf32>
    %122 = arith.truncf %121 : vector<8x128xf32> to vector<8x128xbf16>
    %123 = arith.index_cast %c2_i32 : i32 to index
    %c0_37 = arith.constant 0 : index
    %c0_38 = arith.constant 0 : index
    %124 = vector.load %arg5[%123, %c0_37, %c0_38] : memref<8x8x128xbf16, #tpu.memory_space<vmem>>, vector<1x8x128xbf16>
    %125 = vector.shape_cast %124 : vector<1x8x128xbf16> to vector<8x128xbf16>
    %126 = vector.shape_cast %122 : vector<8x128xbf16> to vector<1x8x128xbf16>
    tpu.vector_store %arg5[%123, %c0_37, %c0_38], %126 {strides = array<i32>} : memref<8x8x128xbf16, #tpu.memory_space<vmem>>, vector<1x8x128xbf16>,
    %c3_i32 = arith.constant 3 : i32
    %127 = arith.index_cast %c3_i32 : i32 to index
    %c0_39 = arith.constant 0 : index
    %c0_40 = arith.constant 0 : index
    %128 = vector.load %arg2[%127, %c0_39, %c0_40] : memref<8x8x384xbf16, #tpu.memory_space<vmem>>, vector<1x8x384xbf16>
    %129 = vector.shape_cast %128 : vector<1x8x384xbf16> to vector<8x384xbf16>
    %130 = arith.extf %129 : vector<8x384xbf16> to vector<8x384xf32>
    %cst_41 = arith.constant dense<0.000000e+00> : vector<8x384xf32>
    %131 = tpu.matmul %122, %3, %cst_41 {dimension_numbers = #tpu.dot_dimension_numbers<[1], [0], [0], [1], [0, 0, 1, 1], [], []>} : vector<8x128xbf16>, vector<128x384xbf16>, vector<8x384xf32> -> vector<8x384xf32>
    %132 = vector.extract_strided_slice %130 {offsets = [0, 0], sizes = [8, 128], strides = [1, 1]} : vector<8x384xf32> to vector<8x128xf32>
    %133 = vector.extract_strided_slice %130 {offsets = [0, 128], sizes = [8, 128], strides = [1, 1]} : vector<8x384xf32> to vector<8x128xf32>
    %134 = vector.extract_strided_slice %130 {offsets = [0, 256], sizes = [8, 128], strides = [1, 1]} : vector<8x384xf32> to vector<8x128xf32>
    %135 = vector.extract_strided_slice %131 {offsets = [0, 0], sizes = [8, 128], strides = [1, 1]} : vector<8x384xf32> to vector<8x128xf32>
    %136 = vector.extract_strided_slice %131 {offsets = [0, 128], sizes = [8, 128], strides = [1, 1]} : vector<8x384xf32> to vector<8x128xf32>
    %137 = vector.extract_strided_slice %131 {offsets = [0, 256], sizes = [8, 128], strides = [1, 1]} : vector<8x384xf32> to vector<8x128xf32>
    %138 = vector.broadcast %4 : vector<1x128xf32> to vector<8x128xf32>
    %139 = arith.addf %137, %138 : vector<8x128xf32>
    %140 = arith.addf %132, %135 : vector<8x128xf32>
    %cst_42 = arith.constant 5.000000e-01 : f32
    %141 = vector.broadcast %cst_42 : f32 to vector<8x128xf32>
    %142 = arith.mulf %141, %140 : vector<8x128xf32>
    %143 = math.tanh %142 : vector<8x128xf32>
    %cst_43 = arith.constant 1.000000e+00 : f32
    %144 = vector.broadcast %cst_43 : f32 to vector<8x128xf32>
    %145 = arith.addf %144, %143 : vector<8x128xf32>
    %cst_44 = arith.constant 5.000000e-01 : f32
    %146 = vector.broadcast %cst_44 : f32 to vector<8x128xf32>
    %147 = arith.mulf %146, %145 : vector<8x128xf32>
    %148 = arith.addf %133, %136 : vector<8x128xf32>
    %cst_45 = arith.constant 5.000000e-01 : f32
    %149 = vector.broadcast %cst_45 : f32 to vector<8x128xf32>
    %150 = arith.mulf %149, %148 : vector<8x128xf32>
    %151 = math.tanh %150 : vector<8x128xf32>
    %cst_46 = arith.constant 1.000000e+00 : f32
    %152 = vector.broadcast %cst_46 : f32 to vector<8x128xf32>
    %153 = arith.addf %152, %151 : vector<8x128xf32>
    %cst_47 = arith.constant 5.000000e-01 : f32
    %154 = vector.broadcast %cst_47 : f32 to vector<8x128xf32>
    %155 = arith.mulf %154, %153 : vector<8x128xf32>
    %156 = arith.mulf %147, %139 : vector<8x128xf32>
    %157 = arith.addf %134, %156 : vector<8x128xf32>
    %158 = math.tanh %157 : vector<8x128xf32>
    %159 = arith.subf %121, %158 : vector<8x128xf32>
    %160 = arith.mulf %155, %159 : vector<8x128xf32>
    %161 = arith.addf %158, %160 : vector<8x128xf32>
    %162 = arith.truncf %161 : vector<8x128xf32> to vector<8x128xbf16>
    %163 = arith.index_cast %c3_i32 : i32 to index
    %c0_48 = arith.constant 0 : index
    %c0_49 = arith.constant 0 : index
    %164 = vector.load %arg5[%163, %c0_48, %c0_49] : memref<8x8x128xbf16, #tpu.memory_space<vmem>>, vector<1x8x128xbf16>
    %165 = vector.shape_cast %164 : vector<1x8x128xbf16> to vector<8x128xbf16>
    %166 = vector.shape_cast %162 : vector<8x128xbf16> to vector<1x8x128xbf16>
    tpu.vector_store %arg5[%163, %c0_48, %c0_49], %166 {strides = array<i32>} : memref<8x8x128xbf16, #tpu.memory_space<vmem>>, vector<1x8x128xbf16>,
    %c4_i32 = arith.constant 4 : i32
    %167 = arith.index_cast %c4_i32 : i32 to index
    %c0_50 = arith.constant 0 : index
    %c0_51 = arith.constant 0 : index
    %168 = vector.load %arg2[%167, %c0_50, %c0_51] : memref<8x8x384xbf16, #tpu.memory_space<vmem>>, vector<1x8x384xbf16>
    %169 = vector.shape_cast %168 : vector<1x8x384xbf16> to vector<8x384xbf16>
    %170 = arith.extf %169 : vector<8x384xbf16> to vector<8x384xf32>
    %cst_52 = arith.constant dense<0.000000e+00> : vector<8x384xf32>
    %171 = tpu.matmul %162, %3, %cst_52 {dimension_numbers = #tpu.dot_dimension_numbers<[1], [0], [0], [1], [0, 0, 1, 1], [], []>} : vector<8x128xbf16>, vector<128x384xbf16>, vector<8x384xf32> -> vector<8x384xf32>
    %172 = vector.extract_strided_slice %170 {offsets = [0, 0], sizes = [8, 128], strides = [1, 1]} : vector<8x384xf32> to vector<8x128xf32>
    %173 = vector.extract_strided_slice %170 {offsets = [0, 128], sizes = [8, 128], strides = [1, 1]} : vector<8x384xf32> to vector<8x128xf32>
    %174 = vector.extract_strided_slice %170 {offsets = [0, 256], sizes = [8, 128], strides = [1, 1]} : vector<8x384xf32> to vector<8x128xf32>
    %175 = vector.extract_strided_slice %171 {offsets = [0, 0], sizes = [8, 128], strides = [1, 1]} : vector<8x384xf32> to vector<8x128xf32>
    %176 = vector.extract_strided_slice %171 {offsets = [0, 128], sizes = [8, 128], strides = [1, 1]} : vector<8x384xf32> to vector<8x128xf32>
    %177 = vector.extract_strided_slice %171 {offsets = [0, 256], sizes = [8, 128], strides = [1, 1]} : vector<8x384xf32> to vector<8x128xf32>
    %178 = vector.broadcast %4 : vector<1x128xf32> to vector<8x128xf32>
    %179 = arith.addf %177, %178 : vector<8x128xf32>
    %180 = arith.addf %172, %175 : vector<8x128xf32>
    %cst_53 = arith.constant 5.000000e-01 : f32
    %181 = vector.broadcast %cst_53 : f32 to vector<8x128xf32>
    %182 = arith.mulf %181, %180 : vector<8x128xf32>
    %183 = math.tanh %182 : vector<8x128xf32>
    %cst_54 = arith.constant 1.000000e+00 : f32
    %184 = vector.broadcast %cst_54 : f32 to vector<8x128xf32>
    %185 = arith.addf %184, %183 : vector<8x128xf32>
    %cst_55 = arith.constant 5.000000e-01 : f32
    %186 = vector.broadcast %cst_55 : f32 to vector<8x128xf32>
    %187 = arith.mulf %186, %185 : vector<8x128xf32>
    %188 = arith.addf %173, %176 : vector<8x128xf32>
    %cst_56 = arith.constant 5.000000e-01 : f32
    %189 = vector.broadcast %cst_56 : f32 to vector<8x128xf32>
    %190 = arith.mulf %189, %188 : vector<8x128xf32>
    %191 = math.tanh %190 : vector<8x128xf32>
    %cst_57 = arith.constant 1.000000e+00 : f32
    %192 = vector.broadcast %cst_57 : f32 to vector<8x128xf32>
    %193 = arith.addf %192, %191 : vector<8x128xf32>
    %cst_58 = arith.constant 5.000000e-01 : f32
    %194 = vector.broadcast %cst_58 : f32 to vector<8x128xf32>
    %195 = arith.mulf %194, %193 : vector<8x128xf32>
    %196 = arith.mulf %187, %179 : vector<8x128xf32>
    %197 = arith.addf %174, %196 : vector<8x128xf32>
    %198 = math.tanh %197 : vector<8x128xf32>
    %199 = arith.subf %161, %198 : vector<8x128xf32>
    %200 = arith.mulf %195, %199 : vector<8x128xf32>
    %201 = arith.addf %198, %200 : vector<8x128xf32>
    %202 = arith.truncf %201 : vector<8x128xf32> to vector<8x128xbf16>
    %203 = arith.index_cast %c4_i32 : i32 to index
    %c0_59 = arith.constant 0 : index
    %c0_60 = arith.constant 0 : index
    %204 = vector.load %arg5[%203, %c0_59, %c0_60] : memref<8x8x128xbf16, #tpu.memory_space<vmem>>, vector<1x8x128xbf16>
    %205 = vector.shape_cast %204 : vector<1x8x128xbf16> to vector<8x128xbf16>
    %206 = vector.shape_cast %202 : vector<8x128xbf16> to vector<1x8x128xbf16>
    tpu.vector_store %arg5[%203, %c0_59, %c0_60], %206 {strides = array<i32>} : memref<8x8x128xbf16, #tpu.memory_space<vmem>>, vector<1x8x128xbf16>,
    %c5_i32 = arith.constant 5 : i32
    %207 = arith.index_cast %c5_i32 : i32 to index
    %c0_61 = arith.constant 0 : index
    %c0_62 = arith.constant 0 : index
    %208 = vector.load %arg2[%207, %c0_61, %c0_62] : memref<8x8x384xbf16, #tpu.memory_space<vmem>>, vector<1x8x384xbf16>
    %209 = vector.shape_cast %208 : vector<1x8x384xbf16> to vector<8x384xbf16>
    %210 = arith.extf %209 : vector<8x384xbf16> to vector<8x384xf32>
    %cst_63 = arith.constant dense<0.000000e+00> : vector<8x384xf32>
    %211 = tpu.matmul %202, %3, %cst_63 {dimension_numbers = #tpu.dot_dimension_numbers<[1], [0], [0], [1], [0, 0, 1, 1], [], []>} : vector<8x128xbf16>, vector<128x384xbf16>, vector<8x384xf32> -> vector<8x384xf32>
    %212 = vector.extract_strided_slice %210 {offsets = [0, 0], sizes = [8, 128], strides = [1, 1]} : vector<8x384xf32> to vector<8x128xf32>
    %213 = vector.extract_strided_slice %210 {offsets = [0, 128], sizes = [8, 128], strides = [1, 1]} : vector<8x384xf32> to vector<8x128xf32>
    %214 = vector.extract_strided_slice %210 {offsets = [0, 256], sizes = [8, 128], strides = [1, 1]} : vector<8x384xf32> to vector<8x128xf32>
    %215 = vector.extract_strided_slice %211 {offsets = [0, 0], sizes = [8, 128], strides = [1, 1]} : vector<8x384xf32> to vector<8x128xf32>
    %216 = vector.extract_strided_slice %211 {offsets = [0, 128], sizes = [8, 128], strides = [1, 1]} : vector<8x384xf32> to vector<8x128xf32>
    %217 = vector.extract_strided_slice %211 {offsets = [0, 256], sizes = [8, 128], strides = [1, 1]} : vector<8x384xf32> to vector<8x128xf32>
    %218 = vector.broadcast %4 : vector<1x128xf32> to vector<8x128xf32>
    %219 = arith.addf %217, %218 : vector<8x128xf32>
    %220 = arith.addf %212, %215 : vector<8x128xf32>
    %cst_64 = arith.constant 5.000000e-01 : f32
    %221 = vector.broadcast %cst_64 : f32 to vector<8x128xf32>
    %222 = arith.mulf %221, %220 : vector<8x128xf32>
    %223 = math.tanh %222 : vector<8x128xf32>
    %cst_65 = arith.constant 1.000000e+00 : f32
    %224 = vector.broadcast %cst_65 : f32 to vector<8x128xf32>
    %225 = arith.addf %224, %223 : vector<8x128xf32>
    %cst_66 = arith.constant 5.000000e-01 : f32
    %226 = vector.broadcast %cst_66 : f32 to vector<8x128xf32>
    %227 = arith.mulf %226, %225 : vector<8x128xf32>
    %228 = arith.addf %213, %216 : vector<8x128xf32>
    %cst_67 = arith.constant 5.000000e-01 : f32
    %229 = vector.broadcast %cst_67 : f32 to vector<8x128xf32>
    %230 = arith.mulf %229, %228 : vector<8x128xf32>
    %231 = math.tanh %230 : vector<8x128xf32>
    %cst_68 = arith.constant 1.000000e+00 : f32
    %232 = vector.broadcast %cst_68 : f32 to vector<8x128xf32>
    %233 = arith.addf %232, %231 : vector<8x128xf32>
    %cst_69 = arith.constant 5.000000e-01 : f32
    %234 = vector.broadcast %cst_69 : f32 to vector<8x128xf32>
    %235 = arith.mulf %234, %233 : vector<8x128xf32>
    %236 = arith.mulf %227, %219 : vector<8x128xf32>
    %237 = arith.addf %214, %236 : vector<8x128xf32>
    %238 = math.tanh %237 : vector<8x128xf32>
    %239 = arith.subf %201, %238 : vector<8x128xf32>
    %240 = arith.mulf %235, %239 : vector<8x128xf32>
    %241 = arith.addf %238, %240 : vector<8x128xf32>
    %242 = arith.truncf %241 : vector<8x128xf32> to vector<8x128xbf16>
    %243 = arith.index_cast %c5_i32 : i32 to index
    %c0_70 = arith.constant 0 : index
    %c0_71 = arith.constant 0 : index
    %244 = vector.load %arg5[%243, %c0_70, %c0_71] : memref<8x8x128xbf16, #tpu.memory_space<vmem>>, vector<1x8x128xbf16>
    %245 = vector.shape_cast %244 : vector<1x8x128xbf16> to vector<8x128xbf16>
    %246 = vector.shape_cast %242 : vector<8x128xbf16> to vector<1x8x128xbf16>
    tpu.vector_store %arg5[%243, %c0_70, %c0_71], %246 {strides = array<i32>} : memref<8x8x128xbf16, #tpu.memory_space<vmem>>, vector<1x8x128xbf16>,
    %c6_i32 = arith.constant 6 : i32
    %247 = arith.index_cast %c6_i32 : i32 to index
    %c0_72 = arith.constant 0 : index
    %c0_73 = arith.constant 0 : index
    %248 = vector.load %arg2[%247, %c0_72, %c0_73] : memref<8x8x384xbf16, #tpu.memory_space<vmem>>, vector<1x8x384xbf16>
    %249 = vector.shape_cast %248 : vector<1x8x384xbf16> to vector<8x384xbf16>
    %250 = arith.extf %249 : vector<8x384xbf16> to vector<8x384xf32>
    %cst_74 = arith.constant dense<0.000000e+00> : vector<8x384xf32>
    %251 = tpu.matmul %242, %3, %cst_74 {dimension_numbers = #tpu.dot_dimension_numbers<[1], [0], [0], [1], [0, 0, 1, 1], [], []>} : vector<8x128xbf16>, vector<128x384xbf16>, vector<8x384xf32> -> vector<8x384xf32>
    %252 = vector.extract_strided_slice %250 {offsets = [0, 0], sizes = [8, 128], strides = [1, 1]} : vector<8x384xf32> to vector<8x128xf32>
    %253 = vector.extract_strided_slice %250 {offsets = [0, 128], sizes = [8, 128], strides = [1, 1]} : vector<8x384xf32> to vector<8x128xf32>
    %254 = vector.extract_strided_slice %250 {offsets = [0, 256], sizes = [8, 128], strides = [1, 1]} : vector<8x384xf32> to vector<8x128xf32>
    %255 = vector.extract_strided_slice %251 {offsets = [0, 0], sizes = [8, 128], strides = [1, 1]} : vector<8x384xf32> to vector<8x128xf32>
    %256 = vector.extract_strided_slice %251 {offsets = [0, 128], sizes = [8, 128], strides = [1, 1]} : vector<8x384xf32> to vector<8x128xf32>
    %257 = vector.extract_strided_slice %251 {offsets = [0, 256], sizes = [8, 128], strides = [1, 1]} : vector<8x384xf32> to vector<8x128xf32>
    %258 = vector.broadcast %4 : vector<1x128xf32> to vector<8x128xf32>
    %259 = arith.addf %257, %258 : vector<8x128xf32>
    %260 = arith.addf %252, %255 : vector<8x128xf32>
    %cst_75 = arith.constant 5.000000e-01 : f32
    %261 = vector.broadcast %cst_75 : f32 to vector<8x128xf32>
    %262 = arith.mulf %261, %260 : vector<8x128xf32>
    %263 = math.tanh %262 : vector<8x128xf32>
    %cst_76 = arith.constant 1.000000e+00 : f32
    %264 = vector.broadcast %cst_76 : f32 to vector<8x128xf32>
    %265 = arith.addf %264, %263 : vector<8x128xf32>
    %cst_77 = arith.constant 5.000000e-01 : f32
    %266 = vector.broadcast %cst_77 : f32 to vector<8x128xf32>
    %267 = arith.mulf %266, %265 : vector<8x128xf32>
    %268 = arith.addf %253, %256 : vector<8x128xf32>
    %cst_78 = arith.constant 5.000000e-01 : f32
    %269 = vector.broadcast %cst_78 : f32 to vector<8x128xf32>
    %270 = arith.mulf %269, %268 : vector<8x128xf32>
    %271 = math.tanh %270 : vector<8x128xf32>
    %cst_79 = arith.constant 1.000000e+00 : f32
    %272 = vector.broadcast %cst_79 : f32 to vector<8x128xf32>
    %273 = arith.addf %272, %271 : vector<8x128xf32>
    %cst_80 = arith.constant 5.000000e-01 : f32
    %274 = vector.broadcast %cst_80 : f32 to vector<8x128xf32>
    %275 = arith.mulf %274, %273 : vector<8x128xf32>
    %276 = arith.mulf %267, %259 : vector<8x128xf32>
    %277 = arith.addf %254, %276 : vector<8x128xf32>
    %278 = math.tanh %277 : vector<8x128xf32>
    %279 = arith.subf %241, %278 : vector<8x128xf32>
    %280 = arith.mulf %275, %279 : vector<8x128xf32>
    %281 = arith.addf %278, %280 : vector<8x128xf32>
    %282 = arith.truncf %281 : vector<8x128xf32> to vector<8x128xbf16>
    %283 = arith.index_cast %c6_i32 : i32 to index
    %c0_81 = arith.constant 0 : index
    %c0_82 = arith.constant 0 : index
    %284 = vector.load %arg5[%283, %c0_81, %c0_82] : memref<8x8x128xbf16, #tpu.memory_space<vmem>>, vector<1x8x128xbf16>
    %285 = vector.shape_cast %284 : vector<1x8x128xbf16> to vector<8x128xbf16>
    %286 = vector.shape_cast %282 : vector<8x128xbf16> to vector<1x8x128xbf16>
    tpu.vector_store %arg5[%283, %c0_81, %c0_82], %286 {strides = array<i32>} : memref<8x8x128xbf16, #tpu.memory_space<vmem>>, vector<1x8x128xbf16>,
    %c7_i32 = arith.constant 7 : i32
    %287 = arith.index_cast %c7_i32 : i32 to index
    %c0_83 = arith.constant 0 : index
    %c0_84 = arith.constant 0 : index
    %288 = vector.load %arg2[%287, %c0_83, %c0_84] : memref<8x8x384xbf16, #tpu.memory_space<vmem>>, vector<1x8x384xbf16>
    %289 = vector.shape_cast %288 : vector<1x8x384xbf16> to vector<8x384xbf16>
    %290 = arith.extf %289 : vector<8x384xbf16> to vector<8x384xf32>
    %cst_85 = arith.constant dense<0.000000e+00> : vector<8x384xf32>
    %291 = tpu.matmul %282, %3, %cst_85 {dimension_numbers = #tpu.dot_dimension_numbers<[1], [0], [0], [1], [0, 0, 1, 1], [], []>} : vector<8x128xbf16>, vector<128x384xbf16>, vector<8x384xf32> -> vector<8x384xf32>
    %292 = vector.extract_strided_slice %290 {offsets = [0, 0], sizes = [8, 128], strides = [1, 1]} : vector<8x384xf32> to vector<8x128xf32>
    %293 = vector.extract_strided_slice %290 {offsets = [0, 128], sizes = [8, 128], strides = [1, 1]} : vector<8x384xf32> to vector<8x128xf32>
    %294 = vector.extract_strided_slice %290 {offsets = [0, 256], sizes = [8, 128], strides = [1, 1]} : vector<8x384xf32> to vector<8x128xf32>
    %295 = vector.extract_strided_slice %291 {offsets = [0, 0], sizes = [8, 128], strides = [1, 1]} : vector<8x384xf32> to vector<8x128xf32>
    %296 = vector.extract_strided_slice %291 {offsets = [0, 128], sizes = [8, 128], strides = [1, 1]} : vector<8x384xf32> to vector<8x128xf32>
    %297 = vector.extract_strided_slice %291 {offsets = [0, 256], sizes = [8, 128], strides = [1, 1]} : vector<8x384xf32> to vector<8x128xf32>
    %298 = vector.broadcast %4 : vector<1x128xf32> to vector<8x128xf32>
    %299 = arith.addf %297, %298 : vector<8x128xf32>
    %300 = arith.addf %292, %295 : vector<8x128xf32>
    %cst_86 = arith.constant 5.000000e-01 : f32
    %301 = vector.broadcast %cst_86 : f32 to vector<8x128xf32>
    %302 = arith.mulf %301, %300 : vector<8x128xf32>
    %303 = math.tanh %302 : vector<8x128xf32>
    %cst_87 = arith.constant 1.000000e+00 : f32
    %304 = vector.broadcast %cst_87 : f32 to vector<8x128xf32>
    %305 = arith.addf %304, %303 : vector<8x128xf32>
    %cst_88 = arith.constant 5.000000e-01 : f32
    %306 = vector.broadcast %cst_88 : f32 to vector<8x128xf32>
    %307 = arith.mulf %306, %305 : vector<8x128xf32>
    %308 = arith.addf %293, %296 : vector<8x128xf32>
    %cst_89 = arith.constant 5.000000e-01 : f32
    %309 = vector.broadcast %cst_89 : f32 to vector<8x128xf32>
    %310 = arith.mulf %309, %308 : vector<8x128xf32>
    %311 = math.tanh %310 : vector<8x128xf32>
    %cst_90 = arith.constant 1.000000e+00 : f32
    %312 = vector.broadcast %cst_90 : f32 to vector<8x128xf32>
    %313 = arith.addf %312, %311 : vector<8x128xf32>
    %cst_91 = arith.constant 5.000000e-01 : f32
    %314 = vector.broadcast %cst_91 : f32 to vector<8x128xf32>
    %315 = arith.mulf %314, %313 : vector<8x128xf32>
    %316 = arith.mulf %307, %299 : vector<8x128xf32>
    %317 = arith.addf %294, %316 : vector<8x128xf32>
    %318 = math.tanh %317 : vector<8x128xf32>
    %319 = arith.subf %281, %318 : vector<8x128xf32>
    %320 = arith.mulf %315, %319 : vector<8x128xf32>
    %321 = arith.addf %318, %320 : vector<8x128xf32>
    %322 = arith.truncf %321 : vector<8x128xf32> to vector<8x128xbf16>
    %323 = arith.index_cast %c7_i32 : i32 to index
    %c0_92 = arith.constant 0 : index
    %c0_93 = arith.constant 0 : index
    %324 = vector.load %arg5[%323, %c0_92, %c0_93] : memref<8x8x128xbf16, #tpu.memory_space<vmem>>, vector<1x8x128xbf16>
    %325 = vector.shape_cast %324 : vector<1x8x128xbf16> to vector<8x128xbf16>
    %326 = vector.shape_cast %322 : vector<8x128xbf16> to vector<1x8x128xbf16>
    tpu.vector_store %arg5[%323, %c0_92, %c0_93], %326 {strides = array<i32>} : memref<8x8x128xbf16, #tpu.memory_space<vmem>>, vector<1x8x128xbf16>,
    %c8_i32 = arith.constant 8 : i32
    %c0_94 = arith.constant 0 : index
    %c0_95 = arith.constant 0 : index
    %327 = vector.load %arg7[%c0_94, %c0_95] : memref<8x128xf32, #tpu.memory_space<vmem>>, vector<8x128xf32>
    tpu.vector_store %arg7[%c0_94, %c0_95], %321 {strides = array<i32>} : memref<8x128xf32, #tpu.memory_space<vmem>>, vector<8x128xf32>,
    %c0_i32_96 = arith.constant 0 : i32
    %328 = arith.cmpi eq, %arg1, %c0_i32_96 : i32
    %329 = arith.extui %328 : i1 to i32
    %c0_i32_97 = arith.constant 0 : i32
    %330 = arith.cmpi ne, %329, %c0_i32_97 : i32
    scf.if %330 {
      %c0_98 = arith.constant 0 : index
      %c0_99 = arith.constant 0 : index
      %331 = vector.load %arg6[%c0_98, %c0_99] : memref<8x128xf32, #tpu.memory_space<vmem>>, vector<8x128xf32>
      tpu.vector_store %arg6[%c0_98, %c0_99], %321 {strides = array<i32>} : memref<8x128xf32, #tpu.memory_space<vmem>>, vector<8x128xf32>,
    } else {
    }
    return
  }
  func.func @transform_0(%arg0: i32, %arg1: i32) -> (i32, i32, i32) {
    %c0_i32 = arith.constant 0 : i32
    %c0_i32_0 = arith.constant 0 : i32
    return %arg1, %arg0, %c0_i32 : i32, i32, i32
  }
  func.func @transform_1(%arg0: i32, %arg1: i32) -> (i32, i32) {
    %c0_i32 = arith.constant 0 : i32
    %c0_i32_0 = arith.constant 0 : i32
    %c0_i32_1 = arith.constant 0 : i32
    return %c0_i32, %c0_i32_0 : i32, i32
  }
  func.func @transform_2(%arg0: i32, %arg1: i32) -> (i32, i32) {
    %c0_i32 = arith.constant 0 : i32
    %c0_i32_0 = arith.constant 0 : i32
    %c0_i32_1 = arith.constant 0 : i32
    return %c0_i32, %c0_i32_0 : i32, i32
  }
  func.func @transform_3(%arg0: i32, %arg1: i32) -> (i32, i32, i32) {
    %c0_i32 = arith.constant 0 : i32
    %c0_i32_0 = arith.constant 0 : i32
    return %arg1, %arg0, %c0_i32 : i32, i32, i32
  }
  func.func @transform_4(%arg0: i32, %arg1: i32) -> (i32, i32) {
    %c0_i32 = arith.constant 0 : i32
    %c0_i32_0 = arith.constant 0 : i32
    return %arg0, %c0_i32 : i32, i32
  }
}

</mosaic_0001>

<bundles_post_ra>
// kernel: encoder_rnn_forward.1
= control target key start
LH: loop header
LB: loop body
LE: loop exit
PB: predicated region body
PF: predicated region fallthrough
CT: control target
= control target key end

     0   :  { %v1424_v1 = vmov 0.0   ;;  %v1425_v2 = vmov 0   ;;  %vm1426_vm0 = vmmov 0   ;;  %v1427_v26 = vmov 0.0|0.0   ;;  %s1982_s1 = inlined_call_operand.vmem [shape: bf16[128,384], index: 1, kind: input, shape index: {}]   ;;  %s1983_s0 = inlined_call_operand.vmem [shape: bf16[8,8,384], index: 0, kind: input, shape index: {}]   ;;  %s1984_s2 = inlined_call_operand.vmem [shape: f32[1,128], index: 2, kind: input, shape index: {}]   ;;  %s1985_s3 = inlined_call_operand.vmem [shape: bf16[8,8,128], index: 3, kind: output, shape index: {0}]   ;;  %s1986_s4 = inlined_call_operand.vmem [shape: f32[8,128], index: 4, kind: output, shape index: {1}]  }
   0x1   :  { %v1456_v0 = vld [vmem:[%s1982_s1 + $0x4] ss:$12 sps:$4 sm:$0xff]   ;;  %1176 = vmatprep.subr.bf16.mxu1 %v1424_v1  ;;  %222 = vmatprep.mubr.bf16.mxu0 %v1425_v2  ;;  %v1463_v3 = vld [vmem:[%s1982_s1] ss:$12 sps:$4 sm:$0xff]   ;;  %v1471_v4 = vld [vmem:[%s1982_s1 + $0x1c] ss:$12 sps:$4 sm:$0xff]  }
   0x2   :  { %1192 = vmatprep.mubr.msk.bf16.mxu1 %vm1426_vm0, %v1424_v1  ;;  %190 = vmatprep.subr.bf16.mxu0 %v1456_v0  ;;  %v1477_v5 = vld [vmem:[%s1982_s1 + $0x18] ss:$12 sps:$4 sm:$0xff]   ;;  %v1483_v6 = vld [vmem:[%s1982_s1 + $0x34] ss:$12 sps:$4 sm:$0xff]   ;;  %v1494_v8 = vld [vmem:[%s1982_s1 + $0x30] ss:$12 sps:$4 sm:$0xff]  }
   0x3   :  { %191 = vmatpush1.bf16.msra.mxu0 %v1463_v3  ;;  %v1488_v7 = vld [vmem:[%s1982_s1 + $0x8] ss:$12 sps:$4 sm:$0xff]   ;;  %v1499_v9 = vld [vmem:[%s1982_s1 + $0x4c] ss:$12 sps:$4 sm:$0xff]   ;;  %v1518_v12 = vld [vmem:[%s1982_s1 + $0x64] ss:$12 sps:$4 sm:$0xff]  }
   0x4   :  { %192 = vmatprep.subr.bf16.mxu0 %v1471_v4  ;;  %1177 = vmatpush3.bf16.msra.mxu1 %v1488_v7  ;;  %v1506_v10 = vld [vmem:[%s1982_s1 + $0x20] ss:$12 sps:$4 sm:$0xff]   ;;  %v1512_v11 = vld [vmem:[%s1982_s1 + $0x48] ss:$12 sps:$4 sm:$0xff]   ;;  %v1525_v13 = vld [vmem:[%s1982_s1 + $0x38] ss:$12 sps:$4 sm:$0xff]  }
   0x5   :  { %1178 = vmatprep.subr.bf16.mxu1 %v1424_v1  ;;  %v1531_v14 = vld [vmem:[%s1982_s1 + $0x60] ss:$12 sps:$4 sm:$0xff]   ;;  %v1537_v15 = vld [vmem:[%s1982_s1 + $0x7c] ss:$12 sps:$4 sm:$0xff]   ;;  %v1551_v17 = vld [vmem:[%s1982_s1 + $0x78] ss:$12 sps:$4 sm:$0xff]  }
   0x6   :  { %v1544_v16 = vld [vmem:[%s1982_s1 + $0x50] ss:$12 sps:$4 sm:$0xff]   ;;  %v1557_v18 = vld [vmem:[%s1982_s1 + $0x94] ss:$12 sps:$4 sm:$0xff]   ;;  %v1576_v21 = vld [vmem:[%s1982_s1 + $0xac] ss:$12 sps:$4 sm:$0xff]  }
   0x7   :  { %193 = vmatpush1.bf16.msra.mxu0 %v1477_v5  ;;  %v1563_v19 = vld [vmem:[%s1982_s1 + $0x68] ss:$12 sps:$4 sm:$0xff]   ;;  %v1570_v20 = vld [vmem:[%s1982_s1 + $0x90] ss:$12 sps:$4 sm:$0xff]   ;;  %v1582_v22 = vld [vmem:[%s1982_s1 + $0x80] ss:$12 sps:$4 sm:$0xff]  }
   0x8   :  { %194 = vmatprep.subr.bf16.mxu0 %v1483_v6  ;;  %1179 = vmatpush3.bf16.msra.mxu1 %v1506_v10  ;;  %v1589_v23 = vld [vmem:[%s1982_s1 + $0xa8] ss:$12 sps:$4 sm:$0xff]   ;;  %v1596_v24 = vld [vmem:[%s1982_s1 + $0x98] ss:$12 sps:$4 sm:$0xff]   ;;  %v1604_v25 = vld [vmem:[%s1982_s1 + $0xb0] ss:$12 sps:$4 sm:$0xff]  }
   0x9   :  { %1180 = vmatprep.subr.bf16.mxu1 %v1424_v1  ;;  %v57_v27 = vld [vmem:[%s1983_s0] sm:$0xff]  ;;  %v58_v44 = vld [vmem:[%s1983_s0 + $0x8] sm:$0xf]  ;;  %v1083_v59 = vld [vmem:[%s1983_s0 + $0xc] sm:$0xff] }
   0xa   :  { %v59_v28 = vunpack.c.l.bf16 %v57_v27  ;;  %v60_v36 = vunpack.c.h.bf16 %v57_v27  ;;  %v1651_v41 = vld [vmem:[%s1984_s2] ss:$0 sm:$0xff]  ;;  %v61_v47 = vunpack.c.l.bf16 %v58_v44  ;;  %v299_v60 = vunpack.c.l.bf16 %v1083_v59 }
   0xb   :  { %195 = vmatpush1.bf16.msra.mxu0 %v1494_v8 }
   0xc   :  { %196 = vmatprep.subr.bf16.mxu0 %v1499_v9  ;;  %1181 = vmatpush3.bf16.msra.mxu1 %v1525_v13 }
   0xd   :  { %1182 = vmatprep.subr.bf16.mxu1 %v1424_v1 }
   0xf   :  { %197 = vmatpush1.bf16.msra.mxu0 %v1512_v11 }
  0x10   :  { %198 = vmatprep.subr.bf16.mxu0 %v1518_v12  ;;  %1183 = vmatpush3.bf16.msra.mxu1 %v1544_v16 }
  0x11   :  { %1184 = vmatprep.subr.bf16.mxu1 %v1424_v1 }
  0x13   :  { %199 = vmatpush1.bf16.msra.mxu0 %v1531_v14 }
  0x14   :  { %200 = vmatprep.subr.bf16.mxu0 %v1537_v15  ;;  %1185 = vmatpush3.bf16.msra.mxu1 %v1563_v19 }
  0x15   :  { %1186 = vmatprep.subr.bf16.mxu1 %v1424_v1 }
  0x17   :  { %201 = vmatpush1.bf16.msra.mxu0 %v1551_v17 }
  0x18   :  { %202 = vmatprep.subr.bf16.mxu0 %v1557_v18  ;;  %1187 = vmatpush3.bf16.msra.mxu1 %v1582_v22 }
  0x19   :  { %1188 = vmatprep.subr.bf16.mxu1 %v1424_v1 }
  0x1b   :  { %203 = vmatpush1.bf16.msra.mxu0 %v1570_v20 }
  0x1c   :  { %204 = vmatprep.subr.bf16.mxu0 %v1576_v21  ;;  %1189 = vmatpush3.bf16.msra.mxu1 %v1596_v24 }
  0x1d   :  { %1190 = vmatprep.subr.bf16.mxu1 %v1424_v1 }
  0x1f   :  { %205 = vmatpush1.bf16.msra.mxu0 %v1589_v23 }
  0x20   :  { %302 = vmatprep.subr.bf16.mxu0 %v1456_v0  ;;  %1191 = vmatpush3.bf16.msra.mxu1 %v1604_v25 }
  0x21   :  { %1196 = vmatprep.subr.bf16.mxu1 %v1424_v1 }
  0x22   :  { %223 = vmatmul.mubr.bf16.vlgmr.msra.gmra.mrb[0].mxu0 %v1427_v26 }
  0x23   :  { %303 = vmatpush1.bf16.msra.mxu0 %v1463_v3  ;;  %334 = vmatprep.mubr.bf16.mxu0 %v1425_v2 }
  0x24   :  { %304 = vmatprep.subr.bf16.mxu0 %v1471_v4  ;;  %1193 = vmatmul.mubr.bf16.vlgmr.msra.gmra.mrb[0].mxu1 %v1427_v26 }
  0x25   :  { %1197 = vmatpush3.bf16.msra.mxu1 %v1488_v7  ;;  %1212 = vmatprep.mubr.msk.bf16.mxu1 %vm1426_vm0, %v1424_v1 }
  0x26   :  { %1198 = vmatprep.subr.bf16.mxu1 %v1424_v1 }
  0x27   :  { %305 = vmatpush1.bf16.msra.mxu0 %v1477_v5 }
  0x28   :  { %306 = vmatprep.subr.bf16.mxu0 %v1483_v6 }
  0x29   :  { %1199 = vmatpush3.bf16.msra.mxu1 %v1506_v10 }
  0x2a   :  { %1200 = vmatprep.subr.bf16.mxu1 %v1424_v1 }
  0x2b   :  { %307 = vmatpush1.bf16.msra.mxu0 %v1494_v8 }
  0x2c   :  { %308 = vmatprep.subr.bf16.mxu0 %v1499_v9 }
  0x2d   :  { %1201 = vmatpush3.bf16.msra.mxu1 %v1525_v13 }
  0x2e   :  { %1202 = vmatprep.subr.bf16.mxu1 %v1424_v1 }
  0x2f   :  { %309 = vmatpush1.bf16.msra.mxu0 %v1512_v11 }
  0x30   :  { %310 = vmatprep.subr.bf16.mxu0 %v1518_v12 }
  0x31   :  { %1203 = vmatpush3.bf16.msra.mxu1 %v1544_v16 }
  0x32   :  { %1204 = vmatprep.subr.bf16.mxu1 %v1424_v1 }
  0x33   :  { %311 = vmatpush1.bf16.msra.mxu0 %v1531_v14 }
  0x34   :  { %312 = vmatprep.subr.bf16.mxu0 %v1537_v15 }
  0x35   :  { %1205 = vmatpush3.bf16.msra.mxu1 %v1563_v19 }
  0x36   :  { %1206 = vmatprep.subr.bf16.mxu1 %v1424_v1 }
  0x37   :  { %313 = vmatpush1.bf16.msra.mxu0 %v1551_v17 }
  0x38   :  { %314 = vmatprep.subr.bf16.mxu0 %v1557_v18 }
  0x39   :  { %1207 = vmatpush3.bf16.msra.mxu1 %v1582_v22 }
  0x3a   :  { %1208 = vmatprep.subr.bf16.mxu1 %v1424_v1 }
  0x3b   :  { %315 = vmatpush1.bf16.msra.mxu0 %v1570_v20 }
  0x3c   :  { %316 = vmatprep.subr.bf16.mxu0 %v1576_v21 }
  0x3d   :  { %1209 = vmatpush3.bf16.msra.mxu1 %v1596_v24 }
  0x3e   :  { %1210 = vmatprep.subr.bf16.mxu1 %v1424_v1 }
  0x3f   :  { %317 = vmatpush1.bf16.msra.mxu0 %v1589_v23 }
  0x40   :  { %409 = vmatprep.subr.bf16.mxu0 %v1456_v0 }
  0x41   :  { %1211 = vmatpush3.bf16.msra.mxu1 %v1604_v25 }
  0x42   :  { %1216 = vmatprep.subr.bf16.mxu1 %v1424_v1 }
  0xf5   :  { %v224_v29 = vpop.f32.mrb[0].mxu0 }
  0xf6   :  { %v278_v30 = vadd.f32 %v224_v29, %v59_v28  ;;  %v226_v31 = vpop.f32.mrb[1].mxu0 }
  0xf7   :  { %v228_v32 = vpop.f32.mrb[2].mxu0  ;;  %v265_v35 = vpop.f32.mrb[0].mxu1  ;;  %v283_v40 = vadd.f32 %v226_v31, %v60_v36 }
  0xf8   :  { %v279_v33 = vmul.f32 0.5, %v278_v30  ;;  %v229_v34 = vpop.f32.mrb[3].mxu0  ;;  %v1194_v37 = vpop.f32.mrb[1].mxu1  ;;  %v277_v46 = vadd.f32 %v1651_v41, %v265_v35 }
  0xf9   :  { %v268_v38 = vpop.f32.mrb[2].mxu1  ;;  %v284_v42 = vmul.f32 0.5, %v283_v40  ;;  %v1705_v37 = vld [vmem:[%s1983_s0 + $0x14] ss:$12 sps:$4 sm:$0xff]  }
  0xfa   :  { %1372 = vtanh.f32 %v279_v33  ;;  %v1195_v39 = vpop.f32.mrb[3].mxu1  ;;  %v300_v33 = vunpack.c.h.bf16 %v1083_v59 }
  0xfb   :  { %1374 = vtanh.f32 %v284_v42  ;;  %v301_v39 = vunpack.c.l.bf16 %v1705_v37 }
 0x104   :  { %v1373_v43 = vpop.eup %1372 }
 0x105   :  { %v281_v45 = vadd.f32 1.0, %v1373_v43  ;;  %v1375_v51 = vpop.eup %1374 }
 0x106   :  { %v286_v52 = vadd.f32 1.0, %v1375_v51 }
 0x107   :  { %v282_v48 = vmul.f32 0.5, %v281_v45 }
 0x108   :  { %v287_v54 = vmul.f32 0.5, %v286_v52 }
 0x109   :  { %v288_v49 = vmul.f32 %v282_v48, %v277_v46 }
 0x10b   :  { %v289_v50 = vadd.f32 %v288_v49, %v61_v47 }
 0x10d   :  { %1376 = vtanh.f32 %v289_v50 }
 0x117   :  { %v1377_v53 = vpop.eup %1376 }
 0x118   :  { %v291_v55 = vsub.f32 0.0, %v1377_v53 }
 0x11a   :  { %v292_v56 = vmul.f32 %v291_v55, %v287_v54 }
 0x11c   :  { %v1657_v57 = vadd.f32 %v1377_v53, %v292_v56  ;;  %v1086_v53 = vld [vmem:[%s1983_s0 + $0x18] sm:$0xff] }
 0x11d   :  { %v406_v54 = vunpack.c.l.bf16 %v1086_v53 }
 0x11e   :  { %v294_v58 = vpack.c.bf16 %v1657_v57, %v1657_v57 }
 0x120   :  { %295 = vst [vmem:[%s1985_s3] sm:$0xf] %v294_v58  ;;  %335 = vmatmul.mubr.bf16.vlgmr.msra.gmra.mrb[4].mxu0 %v294_v58  ;;  %1213 = vmatmul.mubr.bf16.vlgmr.msra.gmra.mrb[4].mxu1 %v294_v58 }
 0x121   :  { %410 = vmatpush1.bf16.msra.mxu0 %v1463_v3  ;;  %1217 = vmatpush3.bf16.msra.mxu1 %v1488_v7 }
 0x122   :  { %411 = vmatprep.subr.bf16.mxu0 %v1471_v4  ;;  %1218 = vmatprep.subr.bf16.mxu1 %v1424_v1 }
 0x123   :  { %441 = vmatprep.mubr.bf16.mxu0 %v1425_v2  ;;  %1232 = vmatprep.mubr.msk.bf16.mxu1 %vm1426_vm0, %v1424_v1 }
 0x125   :  { %412 = vmatpush1.bf16.msra.mxu0 %v1477_v5  ;;  %1219 = vmatpush3.bf16.msra.mxu1 %v1506_v10 }
 0x126   :  { %413 = vmatprep.subr.bf16.mxu0 %v1483_v6  ;;  %1220 = vmatprep.subr.bf16.mxu1 %v1424_v1 }
 0x129   :  { %414 = vmatpush1.bf16.msra.mxu0 %v1494_v8  ;;  %1221 = vmatpush3.bf16.msra.mxu1 %v1525_v13 }
 0x12a   :  { %415 = vmatprep.subr.bf16.mxu0 %v1499_v9  ;;  %1222 = vmatprep.subr.bf16.mxu1 %v1424_v1 }
 0x12d   :  { %416 = vmatpush1.bf16.msra.mxu0 %v1512_v11  ;;  %1223 = vmatpush3.bf16.msra.mxu1 %v1544_v16 }
 0x12e   :  { %417 = vmatprep.subr.bf16.mxu0 %v1518_v12  ;;  %1224 = vmatprep.subr.bf16.mxu1 %v1424_v1 }
 0x131   :  { %418 = vmatpush1.bf16.msra.mxu0 %v1531_v14  ;;  %1225 = vmatpush3.bf16.msra.mxu1 %v1563_v19 }
 0x132   :  { %419 = vmatprep.subr.bf16.mxu0 %v1537_v15  ;;  %1226 = vmatprep.subr.bf16.mxu1 %v1424_v1 }
 0x135   :  { %420 = vmatpush1.bf16.msra.mxu0 %v1551_v17  ;;  %1227 = vmatpush3.bf16.msra.mxu1 %v1582_v22 }
 0x136   :  { %421 = vmatprep.subr.bf16.mxu0 %v1557_v18  ;;  %1228 = vmatprep.subr.bf16.mxu1 %v1424_v1 }
 0x139   :  { %422 = vmatpush1.bf16.msra.mxu0 %v1570_v20  ;;  %1229 = vmatpush3.bf16.msra.mxu1 %v1596_v24 }
 0x13a   :  { %423 = vmatprep.subr.bf16.mxu0 %v1576_v21  ;;  %1230 = vmatprep.subr.bf16.mxu1 %v1424_v1 }
 0x13d   :  { %424 = vmatpush1.bf16.msra.mxu0 %v1589_v23  ;;  %1231 = vmatpush3.bf16.msra.mxu1 %v1604_v25 }
 0x13e   :  { %516 = vmatprep.subr.bf16.mxu0 %v1456_v0  ;;  %1236 = vmatprep.subr.bf16.mxu1 %v1424_v1 }
 0x1f3   :  { %v336_v61 = vpop.f32.mrb[4].mxu0  ;;  %v377_v62 = vpop.f32.mrb[4].mxu1 }
 0x1f4   :  { %v384_v63 = vadd.f32 %v336_v61, %v299_v60  ;;  %v338_v26 = vpop.f32.mrb[5].mxu0  ;;  %v1214_v27 = vpop.f32.mrb[5].mxu1  ;;  %v383_v40 = vadd.f32 %v1651_v41, %v377_v62 }
 0x1f5   :  { %v340_v28 = vpop.f32.mrb[6].mxu0  ;;  %v380_v29 = vpop.f32.mrb[6].mxu1  ;;  %v389_v34 = vadd.f32 %v338_v26, %v300_v33  ;;  %v407_v27 = vunpack.c.h.bf16 %v1086_v53 }
 0x1f6   :  { %v385_v30 = vmul.f32 0.5, %v384_v63  ;;  %v341_v31 = vpop.f32.mrb[7].mxu0  ;;  %v1215_v32 = vpop.f32.mrb[7].mxu1 }
 0x1f7   :  { %v390_v35 = vmul.f32 0.5, %v389_v34  ;;  %v408_v32 = vunpack.c.h.bf16 %v1705_v37  ;;  %v1089_v37 = vld [vmem:[%s1983_s0 + $0x24] sm:$0xff] }
 0x1f8   :  { %1378 = vtanh.f32 %v385_v30 }
 0x1f9   :  { %1380 = vtanh.f32 %v390_v35 }
 0x202   :  { %v1379_v36 = vpop.eup %1378 }
 0x203   :  { %v387_v38 = vadd.f32 1.0, %v1379_v36  ;;  %v1381_v45 = vpop.eup %1380 }
 0x204   :  { %v392_v46 = vadd.f32 1.0, %v1381_v45 }
 0x205   :  { %v388_v42 = vmul.f32 0.5, %v387_v38 }
 0x206   :  { %v393_v48 = vmul.f32 0.5, %v392_v46 }
 0x207   :  { %v394_v43 = vmul.f32 %v388_v42, %v383_v40 }
 0x209   :  { %v395_v44 = vadd.f32 %v394_v43, %v301_v39 }
 0x20b   :  { %1382 = vtanh.f32 %v395_v44 }
 0x215   :  { %v1383_v47 = vpop.eup %1382 }
 0x216   :  { %v397_v49 = vsub.f32 %v1657_v57, %v1383_v47 }
 0x218   :  { %v398_v50 = vmul.f32 %v397_v49, %v393_v48 }
 0x21a   :  { %v1710_v51 = vadd.f32 %v1383_v47, %v398_v50  ;;  %v513_v47 = vunpack.c.l.bf16 %v1089_v37 }
 0x21c   :  { %v400_v52 = vpack.c.bf16 %v1710_v51, %v1710_v51 }
 0x21e   :  { %1085 = vst [vmem:[%s1985_s3 + $0x4] sm:$0xf] %v400_v52  ;;  %442 = vmatmul.mubr.bf16.vlgmr.msra.gmra.mrb[8].mxu0 %v400_v52  ;;  %1233 = vmatmul.mubr.bf16.vlgmr.msra.gmra.mrb[8].mxu1 %v400_v52 }
 0x21f   :  { %517 = vmatpush1.bf16.msra.mxu0 %v1463_v3  ;;  %1237 = vmatpush3.bf16.msra.mxu1 %v1488_v7 }
 0x220   :  { %518 = vmatprep.subr.bf16.mxu0 %v1471_v4  ;;  %1238 = vmatprep.subr.bf16.mxu1 %v1424_v1 }
 0x221   :  { %548 = vmatprep.mubr.bf16.mxu0 %v1425_v2  ;;  %1252 = vmatprep.mubr.msk.bf16.mxu1 %vm1426_vm0, %v1424_v1 }
 0x223   :  { %519 = vmatpush1.bf16.msra.mxu0 %v1477_v5  ;;  %1239 = vmatpush3.bf16.msra.mxu1 %v1506_v10 }
 0x224   :  { %520 = vmatprep.subr.bf16.mxu0 %v1483_v6  ;;  %1240 = vmatprep.subr.bf16.mxu1 %v1424_v1 }
 0x227   :  { %521 = vmatpush1.bf16.msra.mxu0 %v1494_v8  ;;  %1241 = vmatpush3.bf16.msra.mxu1 %v1525_v13 }
 0x228   :  { %522 = vmatprep.subr.bf16.mxu0 %v1499_v9  ;;  %1242 = vmatprep.subr.bf16.mxu1 %v1424_v1 }
 0x22b   :  { %523 = vmatpush1.bf16.msra.mxu0 %v1512_v11  ;;  %1243 = vmatpush3.bf16.msra.mxu1 %v1544_v16 }
 0x22c   :  { %524 = vmatprep.subr.bf16.mxu0 %v1518_v12  ;;  %1244 = vmatprep.subr.bf16.mxu1 %v1424_v1 }
 0x22f   :  { %525 = vmatpush1.bf16.msra.mxu0 %v1531_v14  ;;  %1245 = vmatpush3.bf16.msra.mxu1 %v1563_v19 }
 0x230   :  { %526 = vmatprep.subr.bf16.mxu0 %v1537_v15  ;;  %1246 = vmatprep.subr.bf16.mxu1 %v1424_v1 }
 0x233   :  { %527 = vmatpush1.bf16.msra.mxu0 %v1551_v17  ;;  %1247 = vmatpush3.bf16.msra.mxu1 %v1582_v22 }
 0x234   :  { %528 = vmatprep.subr.bf16.mxu0 %v1557_v18  ;;  %1248 = vmatprep.subr.bf16.mxu1 %v1424_v1 }
 0x237   :  { %529 = vmatpush1.bf16.msra.mxu0 %v1570_v20  ;;  %1249 = vmatpush3.bf16.msra.mxu1 %v1596_v24 }
 0x238   :  { %530 = vmatprep.subr.bf16.mxu0 %v1576_v21  ;;  %1250 = vmatprep.subr.bf16.mxu1 %v1424_v1 }
 0x23b   :  { %531 = vmatpush1.bf16.msra.mxu0 %v1589_v23  ;;  %1251 = vmatpush3.bf16.msra.mxu1 %v1604_v25 }
 0x23c   :  { %623 = vmatprep.subr.bf16.mxu0 %v1456_v0  ;;  %1256 = vmatprep.subr.bf16.mxu1 %v1424_v1 }
 0x2f1   :  { %v443_v55 = vpop.f32.mrb[8].mxu0  ;;  %v484_v56 = vpop.f32.mrb[8].mxu1 }
 0x2f2   :  { %v491_v57 = vadd.f32 %v443_v55, %v406_v54  ;;  %v445_v58 = vpop.f32.mrb[9].mxu0  ;;  %v1234_v59 = vpop.f32.mrb[9].mxu1  ;;  %v490_v33 = vadd.f32 %v1651_v41, %v484_v56 }
 0x2f3   :  { %v447_v60 = vpop.f32.mrb[10].mxu0  ;;  %v487_v61 = vpop.f32.mrb[10].mxu1  ;;  %v496_v28 = vadd.f32 %v445_v58, %v407_v27  ;;  %v514_v58 = vunpack.c.h.bf16 %v1089_v37 }
 0x2f4   :  { %v492_v62 = vmul.f32 0.5, %v491_v57  ;;  %v448_v63 = vpop.f32.mrb[11].mxu0  ;;  %v1235_v26 = vpop.f32.mrb[11].mxu1 }
 0x2f5   :  { %v497_v29 = vmul.f32 0.5, %v496_v28 }
 0x2f6   :  { %1384 = vtanh.f32 %v492_v62  ;;  %v1806_v62 = vld [vmem:[%s1983_s0 + $0x2c] ss:$12 sps:$4 sm:$0xff]  }
 0x2f7   :  { %1386 = vtanh.f32 %v497_v29  ;;  %v515_v26 = vunpack.c.l.bf16 %v1806_v62 }
 0x300   :  { %v1385_v30 = vpop.eup %1384 }
 0x301   :  { %v494_v31 = vadd.f32 1.0, %v1385_v30  ;;  %v1387_v38 = vpop.eup %1386 }
 0x302   :  { %v499_v39 = vadd.f32 1.0, %v1387_v38 }
 0x303   :  { %v495_v34 = vmul.f32 0.5, %v494_v31 }
 0x304   :  { %v500_v42 = vmul.f32 0.5, %v499_v39 }
 0x305   :  { %v501_v35 = vmul.f32 %v495_v34, %v490_v33 }
 0x307   :  { %v502_v36 = vadd.f32 %v501_v35, %v408_v32 }
 0x309   :  { %1388 = vtanh.f32 %v502_v36 }
 0x313   :  { %v1389_v40 = vpop.eup %1388 }
 0x314   :  { %v504_v43 = vsub.f32 %v1710_v51, %v1389_v40 }
 0x316   :  { %v505_v44 = vmul.f32 %v504_v43, %v500_v42 }
 0x318   :  { %v1758_v45 = vadd.f32 %v1389_v40, %v505_v44  ;;  %v1092_v40 = vld [vmem:[%s1983_s0 + $0x30] sm:$0xff] }
 0x319   :  { %v620_v42 = vunpack.c.l.bf16 %v1092_v40 }
 0x31a   :  { %v507_v46 = vpack.c.bf16 %v1758_v45, %v1758_v45 }
 0x31c   :  { %1088 = vst [vmem:[%s1985_s3 + $0x8] sm:$0xf] %v507_v46  ;;  %549 = vmatmul.mubr.bf16.vlgmr.msra.gmra.mrb[12].mxu0 %v507_v46  ;;  %1253 = vmatmul.mubr.bf16.vlgmr.msra.gmra.mrb[12].mxu1 %v507_v46 }
 0x31d   :  { %624 = vmatpush1.bf16.msra.mxu0 %v1463_v3  ;;  %1257 = vmatpush3.bf16.msra.mxu1 %v1488_v7 }
 0x31e   :  { %625 = vmatprep.subr.bf16.mxu0 %v1471_v4  ;;  %1258 = vmatprep.subr.bf16.mxu1 %v1424_v1 }
 0x31f   :  { %655 = vmatprep.mubr.bf16.mxu0 %v1425_v2  ;;  %1272 = vmatprep.mubr.msk.bf16.mxu1 %vm1426_vm0, %v1424_v1 }
 0x321   :  { %626 = vmatpush1.bf16.msra.mxu0 %v1477_v5  ;;  %1259 = vmatpush3.bf16.msra.mxu1 %v1506_v10 }
 0x322   :  { %627 = vmatprep.subr.bf16.mxu0 %v1483_v6  ;;  %1260 = vmatprep.subr.bf16.mxu1 %v1424_v1 }
 0x325   :  { %628 = vmatpush1.bf16.msra.mxu0 %v1494_v8  ;;  %1261 = vmatpush3.bf16.msra.mxu1 %v1525_v13 }
 0x326   :  { %629 = vmatprep.subr.bf16.mxu0 %v1499_v9  ;;  %1262 = vmatprep.subr.bf16.mxu1 %v1424_v1 }
 0x329   :  { %630 = vmatpush1.bf16.msra.mxu0 %v1512_v11  ;;  %1263 = vmatpush3.bf16.msra.mxu1 %v1544_v16 }
 0x32a   :  { %631 = vmatprep.subr.bf16.mxu0 %v1518_v12  ;;  %1264 = vmatprep.subr.bf16.mxu1 %v1424_v1 }
 0x32d   :  { %632 = vmatpush1.bf16.msra.mxu0 %v1531_v14  ;;  %1265 = vmatpush3.bf16.msra.mxu1 %v1563_v19 }
 0x32e   :  { %633 = vmatprep.subr.bf16.mxu0 %v1537_v15  ;;  %1266 = vmatprep.subr.bf16.mxu1 %v1424_v1 }
 0x331   :  { %634 = vmatpush1.bf16.msra.mxu0 %v1551_v17  ;;  %1267 = vmatpush3.bf16.msra.mxu1 %v1582_v22 }
 0x332   :  { %635 = vmatprep.subr.bf16.mxu0 %v1557_v18  ;;  %1268 = vmatprep.subr.bf16.mxu1 %v1424_v1 }
 0x335   :  { %636 = vmatpush1.bf16.msra.mxu0 %v1570_v20  ;;  %1269 = vmatpush3.bf16.msra.mxu1 %v1596_v24 }
 0x336   :  { %637 = vmatprep.subr.bf16.mxu0 %v1576_v21  ;;  %1270 = vmatprep.subr.bf16.mxu1 %v1424_v1 }
 0x339   :  { %638 = vmatpush1.bf16.msra.mxu0 %v1589_v23  ;;  %1271 = vmatpush3.bf16.msra.mxu1 %v1604_v25 }
 0x33a   :  { %730 = vmatprep.subr.bf16.mxu0 %v1456_v0  ;;  %1276 = vmatprep.subr.bf16.mxu1 %v1424_v1 }
 0x3ef   :  { %v550_v48 = vpop.f32.mrb[12].mxu0  ;;  %v591_v49 = vpop.f32.mrb[12].mxu1 }
 0x3f0   :  { %v598_v50 = vadd.f32 %v550_v48, %v513_v47  ;;  %v552_v51 = vpop.f32.mrb[13].mxu0  ;;  %v1254_v52 = vpop.f32.mrb[13].mxu1  ;;  %v597_v27 = vadd.f32 %v1651_v41, %v591_v49 }
 0x3f1   :  { %v554_v53 = vpop.f32.mrb[14].mxu0  ;;  %v594_v54 = vpop.f32.mrb[14].mxu1  ;;  %v603_v59 = vadd.f32 %v552_v51, %v514_v58  ;;  %v621_v52 = vunpack.c.h.bf16 %v1092_v40 }
 0x3f2   :  { %v599_v55 = vmul.f32 0.5, %v598_v50  ;;  %v555_v56 = vpop.f32.mrb[15].mxu0  ;;  %v1255_v57 = vpop.f32.mrb[15].mxu1 }
 0x3f3   :  { %v604_v60 = vmul.f32 0.5, %v603_v59  ;;  %v622_v57 = vunpack.c.h.bf16 %v1806_v62 }
 0x3f4   :  { %1390 = vtanh.f32 %v599_v55 }
 0x3f5   :  { %1392 = vtanh.f32 %v604_v60 }
 0x3fe   :  { %v1391_v61 = vpop.eup %1390 }
 0x3ff   :  { %v601_v63 = vadd.f32 1.0, %v1391_v61  ;;  %v1393_v31 = vpop.eup %1392 }
 0x400   :  { %v606_v32 = vadd.f32 1.0, %v1393_v31 }
 0x401   :  { %v602_v28 = vmul.f32 0.5, %v601_v63 }
 0x402   :  { %v607_v34 = vmul.f32 0.5, %v606_v32 }
 0x403   :  { %v608_v29 = vmul.f32 %v602_v28, %v597_v27 }
 0x405   :  { %v609_v30 = vadd.f32 %v608_v29, %v515_v26 }
 0x407   :  { %1394 = vtanh.f32 %v609_v30 }
 0x411   :  { %v1395_v33 = vpop.eup %1394 }
 0x412   :  { %v611_v35 = vsub.f32 %v1758_v45, %v1395_v33 }
 0x414   :  { %v612_v36 = vmul.f32 %v611_v35, %v607_v34 }
 0x416   :  { %v1811_v38 = vadd.f32 %v1395_v33, %v612_v36 }
 0x418   :  { %v614_v39 = vpack.c.bf16 %v1811_v38, %v1811_v38 }
 0x41a   :  { %1091 = vst [vmem:[%s1985_s3 + $0xc] sm:$0xf] %v614_v39  ;;  %656 = vmatmul.mubr.bf16.vlgmr.msra.gmra.mrb[16].mxu0 %v614_v39  ;;  %1273 = vmatmul.mubr.bf16.vlgmr.msra.gmra.mrb[16].mxu1 %v614_v39 }
 0x41b   :  { %731 = vmatpush1.bf16.msra.mxu0 %v1463_v3  ;;  %1277 = vmatpush3.bf16.msra.mxu1 %v1488_v7 }
 0x41c   :  { %732 = vmatprep.subr.bf16.mxu0 %v1471_v4  ;;  %1278 = vmatprep.subr.bf16.mxu1 %v1424_v1 }
 0x41d   :  { %762 = vmatprep.mubr.bf16.mxu0 %v1425_v2  ;;  %1292 = vmatprep.mubr.msk.bf16.mxu1 %vm1426_vm0, %v1424_v1 }
 0x41f   :  { %733 = vmatpush1.bf16.msra.mxu0 %v1477_v5  ;;  %1279 = vmatpush3.bf16.msra.mxu1 %v1506_v10 }
 0x420   :  { %734 = vmatprep.subr.bf16.mxu0 %v1483_v6  ;;  %1280 = vmatprep.subr.bf16.mxu1 %v1424_v1 }
 0x423   :  { %735 = vmatpush1.bf16.msra.mxu0 %v1494_v8  ;;  %1281 = vmatpush3.bf16.msra.mxu1 %v1525_v13 }
 0x424   :  { %736 = vmatprep.subr.bf16.mxu0 %v1499_v9  ;;  %1282 = vmatprep.subr.bf16.mxu1 %v1424_v1 }
 0x427   :  { %737 = vmatpush1.bf16.msra.mxu0 %v1512_v11  ;;  %1283 = vmatpush3.bf16.msra.mxu1 %v1544_v16 }
 0x428   :  { %738 = vmatprep.subr.bf16.mxu0 %v1518_v12  ;;  %1284 = vmatprep.subr.bf16.mxu1 %v1424_v1 }
 0x42b   :  { %739 = vmatpush1.bf16.msra.mxu0 %v1531_v14  ;;  %1285 = vmatpush3.bf16.msra.mxu1 %v1563_v19 }
 0x42c   :  { %740 = vmatprep.subr.bf16.mxu0 %v1537_v15  ;;  %1286 = vmatprep.subr.bf16.mxu1 %v1424_v1 }
 0x42f   :  { %741 = vmatpush1.bf16.msra.mxu0 %v1551_v17  ;;  %1287 = vmatpush3.bf16.msra.mxu1 %v1582_v22 }
 0x430   :  { %742 = vmatprep.subr.bf16.mxu0 %v1557_v18  ;;  %1288 = vmatprep.subr.bf16.mxu1 %v1424_v1 }
 0x433   :  { %743 = vmatpush1.bf16.msra.mxu0 %v1570_v20  ;;  %1289 = vmatpush3.bf16.msra.mxu1 %v1596_v24 }
 0x434   :  { %744 = vmatprep.subr.bf16.mxu0 %v1576_v21  ;;  %1290 = vmatprep.subr.bf16.mxu1 %v1424_v1 }
 0x437   :  { %745 = vmatpush1.bf16.msra.mxu0 %v1589_v23  ;;  %1291 = vmatpush3.bf16.msra.mxu1 %v1604_v25 }
 0x438   :  { %837 = vmatprep.subr.bf16.mxu0 %v1456_v0  ;;  %1296 = vmatprep.subr.bf16.mxu1 %v1424_v1 }
 0x4ed   :  { %v657_v43 = vpop.f32.mrb[16].mxu0  ;;  %v698_v44 = vpop.f32.mrb[16].mxu1 }
 0x4ee   :  { %v705_v45 = vadd.f32 %v657_v43, %v620_v42  ;;  %v659_v46 = vpop.f32.mrb[17].mxu0  ;;  %v1274_v37 = vpop.f32.mrb[17].mxu1  ;;  %v704_v58 = vadd.f32 %v1651_v41, %v698_v44 }
 0x4ef   :  { %v661_v47 = vpop.f32.mrb[18].mxu0  ;;  %v701_v48 = vpop.f32.mrb[18].mxu1  ;;  %v710_v53 = vadd.f32 %v659_v46, %v621_v52 }
 0x4f0   :  { %v706_v49 = vmul.f32 0.5, %v705_v45  ;;  %v662_v50 = vpop.f32.mrb[19].mxu0  ;;  %v1275_v51 = vpop.f32.mrb[19].mxu1  ;;  %v1907_v45 = vld [vmem:[%s1983_s0 + $0x44] ss:$12 sps:$4 sm:$0xff]  }
 0x4f1   :  { %v711_v54 = vmul.f32 0.5, %v710_v53  ;;  %v729_v37 = vunpack.c.l.bf16 %v1907_v45 }
 0x4f2   :  { %1396 = vtanh.f32 %v706_v49 }
 0x4f3   :  { %1398 = vtanh.f32 %v711_v54 }
 0x4fc   :  { %v1397_v55 = vpop.eup %1396 }
 0x4fd   :  { %v708_v56 = vadd.f32 1.0, %v1397_v55  ;;  %v1399_v63 = vpop.eup %1398 }
 0x4fe   :  { %v713_v26 = vadd.f32 1.0, %v1399_v63 }
 0x4ff   :  { %v709_v59 = vmul.f32 0.5, %v708_v56 }
 0x500   :  { %v714_v28 = vmul.f32 0.5, %v713_v26 }
 0x501   :  { %v715_v60 = vmul.f32 %v709_v59, %v704_v58  ;;  %v1420_v59 = vld [vmem:[%s1982_s1] ss:$12 sps:$4 sm:$0xff]  }
 0x503   :  { %v716_v61 = vadd.f32 %v715_v60, %v622_v57  ;;  %v1421_v60 = vld [vmem:[%s1982_s1 + $0x1c] ss:$12 sps:$4 sm:$0xff]  }
 0x505   :  { %1400 = vtanh.f32 %v716_v61  ;;  %v1422_v61 = vld [vmem:[%s1982_s1 + $0x18] ss:$12 sps:$4 sm:$0xff]  }
 0x50f   :  { %v1401_v27 = vpop.eup %1400 }
 0x510   :  { %v718_v29 = vsub.f32 %v1811_v38, %v1401_v27 }
 0x512   :  { %v719_v30 = vmul.f32 %v718_v29, %v714_v28 }
 0x514   :  { %v1859_v31 = vadd.f32 %v1401_v27, %v719_v30 }
 0x516   :  { %v721_v32 = vpack.c.bf16 %v1859_v31, %v1859_v31 }
 0x518   :  { %1094 = vst [vmem:[%s1985_s3 + $0x10] sm:$0xf] %v721_v32  ;;  %763 = vmatmul.mubr.bf16.vlgmr.msra.gmra.mrb[20].mxu0 %v721_v32  ;;  %1293 = vmatmul.mubr.bf16.vlgmr.msra.gmra.mrb[20].mxu1 %v721_v32 }
 0x519   :  { %838 = vmatpush1.bf16.msra.mxu0 %v1463_v3  ;;  %1297 = vmatpush3.bf16.msra.mxu1 %v1488_v7  ;;  %v1095_v3 = vld [vmem:[%s1983_s0 + $0x3c] sm:$0xff] }
 0x51a   :  { %839 = vmatprep.subr.bf16.mxu0 %v1471_v4  ;;  %1298 = vmatprep.subr.bf16.mxu1 %v1424_v1  ;;  %v727_v4 = vunpack.c.l.bf16 %v1095_v3  ;;  %v728_v42 = vunpack.c.h.bf16 %v1095_v3 }
 0x51b   :  { %869 = vmatprep.mubr.bf16.mxu0 %v1425_v2  ;;  %1312 = vmatprep.mubr.msk.bf16.mxu1 %vm1426_vm0, %v1424_v1 }
 0x51d   :  { %840 = vmatpush1.bf16.msra.mxu0 %v1477_v5  ;;  %1299 = vmatpush3.bf16.msra.mxu1 %v1506_v10 }
 0x51e   :  { %841 = vmatprep.subr.bf16.mxu0 %v1483_v6  ;;  %1300 = vmatprep.subr.bf16.mxu1 %v1424_v1 }
 0x521   :  { %842 = vmatpush1.bf16.msra.mxu0 %v1494_v8  ;;  %1301 = vmatpush3.bf16.msra.mxu1 %v1525_v13 }
 0x522   :  { %843 = vmatprep.subr.bf16.mxu0 %v1499_v9  ;;  %1302 = vmatprep.subr.bf16.mxu1 %v1424_v1 }
 0x525   :  { %844 = vmatpush1.bf16.msra.mxu0 %v1512_v11  ;;  %1303 = vmatpush3.bf16.msra.mxu1 %v1544_v16 }
 0x526   :  { %845 = vmatprep.subr.bf16.mxu0 %v1518_v12  ;;  %1304 = vmatprep.subr.bf16.mxu1 %v1424_v1 }
 0x529   :  { %846 = vmatpush1.bf16.msra.mxu0 %v1531_v14  ;;  %1305 = vmatpush3.bf16.msra.mxu1 %v1563_v19 }
 0x52a   :  { %847 = vmatprep.subr.bf16.mxu0 %v1537_v15  ;;  %1306 = vmatprep.subr.bf16.mxu1 %v1424_v1 }
 0x52d   :  { %848 = vmatpush1.bf16.msra.mxu0 %v1551_v17  ;;  %1307 = vmatpush3.bf16.msra.mxu1 %v1582_v22 }
 0x52e   :  { %849 = vmatprep.subr.bf16.mxu0 %v1557_v18  ;;  %1308 = vmatprep.subr.bf16.mxu1 %v1424_v1 }
 0x531   :  { %850 = vmatpush1.bf16.msra.mxu0 %v1570_v20  ;;  %1309 = vmatpush3.bf16.msra.mxu1 %v1596_v24 }
 0x532   :  { %851 = vmatprep.subr.bf16.mxu0 %v1576_v21  ;;  %1310 = vmatprep.subr.bf16.mxu1 %v1424_v1 }
 0x535   :  { %852 = vmatpush1.bf16.msra.mxu0 %v1589_v23  ;;  %1311 = vmatpush3.bf16.msra.mxu1 %v1604_v25 }
 0x536   :  { %944 = vmatprep.subr.bf16.mxu0 %v1456_v0  ;;  %1316 = vmatprep.subr.bf16.mxu1 %v1424_v1 }
 0x5eb   :  { %v764_v5 = vpop.f32.mrb[20].mxu0  ;;  %v805_v6 = vpop.f32.mrb[20].mxu1 }
 0x5ec   :  { %v812_v62 = vadd.f32 %v764_v5, %v727_v4  ;;  %v766_v33 = vpop.f32.mrb[21].mxu0  ;;  %v1294_v34 = vpop.f32.mrb[21].mxu1  ;;  %v811_v47 = vadd.f32 %v1651_v41, %v805_v6  ;;  %v1101_v5 = vld [vmem:[%s1983_s0 + $0x54] sm:$0xff] }
 0x5ed   :  { %v768_v35 = vpop.f32.mrb[22].mxu0  ;;  %v808_v36 = vpop.f32.mrb[22].mxu1  ;;  %v817_v0 = vadd.f32 %v766_v33, %v728_v42  ;;  %v941_v6 = vunpack.c.l.bf16 %v1101_v5 }
 0x5ee   :  { %v813_v38 = vmul.f32 0.5, %v812_v62  ;;  %v769_v39 = vpop.f32.mrb[23].mxu0  ;;  %v1295_v40 = vpop.f32.mrb[23].mxu1 }
 0x5ef   :  { %v818_v43 = vmul.f32 0.5, %v817_v0 }
 0x5f0   :  { %1402 = vtanh.f32 %v813_v38 }
 0x5f1   :  { %1404 = vtanh.f32 %v818_v43  ;;  %v942_v43 = vunpack.c.h.bf16 %v1101_v5 }
 0x5fa   :  { %v1403_v44 = vpop.eup %1402 }
 0x5fb   :  { %v815_v46 = vadd.f32 1.0, %v1403_v44  ;;  %v1405_v51 = vpop.eup %1404 }
 0x5fc   :  { %v820_v52 = vadd.f32 1.0, %v1405_v51 }
 0x5fd   :  { %v816_v48 = vmul.f32 0.5, %v815_v46 }
 0x5fe   :  { %v821_v54 = vmul.f32 0.5, %v820_v52 }
 0x5ff   :  { %v822_v49 = vmul.f32 %v816_v48, %v811_v47 }
 0x601   :  { %v823_v50 = vadd.f32 %v822_v49, %v729_v37  ;;  %v1102_v37 = vld [vmem:[%s1983_s0 + $0x5c] sm:$0xf] }
 0x602   :  { %v943_v48 = vunpack.c.l.bf16 %v1102_v37 }
 0x603   :  { %1406 = vtanh.f32 %v823_v50 }
 0x60d   :  { %v1407_v53 = vpop.eup %1406 }
 0x60e   :  { %v825_v55 = vsub.f32 %v1859_v31, %v1407_v53 }
 0x610   :  { %v826_v56 = vmul.f32 %v825_v55, %v821_v54 }
 0x612   :  { %v1912_v57 = vadd.f32 %v1407_v53, %v826_v56 }
 0x614   :  { %v828_v58 = vpack.c.bf16 %v1912_v57, %v1912_v57 }
 0x616   :  { %1097 = vst [vmem:[%s1985_s3 + $0x14] sm:$0xf] %v828_v58  ;;  %870 = vmatmul.mubr.bf16.vlgmr.msra.gmra.mrb[24].mxu0 %v828_v58  ;;  %1313 = vmatmul.mubr.bf16.vlgmr.msra.gmra.mrb[24].mxu1 %v828_v58 }
 0x617   :  { %945 = vmatpush1.bf16.msra.mxu0 %v1420_v59  ;;  %1317 = vmatpush3.bf16.msra.mxu1 %v1488_v7  ;;  %v1423_v7 = vld [vmem:[%s1982_s1 + $0x34] ss:$12 sps:$4 sm:$0xff]  }
 0x618   :  { %946 = vmatprep.subr.bf16.mxu0 %v1421_v60  ;;  %1318 = vmatprep.subr.bf16.mxu1 %v1424_v1 }
 0x619   :  { %976 = vmatprep.mubr.bf16.mxu0 %v1425_v2  ;;  %1332 = vmatprep.mubr.msk.bf16.mxu1 %vm1426_vm0, %v1424_v1  ;;  %v1098_v2 = vld [vmem:[%s1983_s0 + $0x48] sm:$0xff] }
 0x61b   :  { %947 = vmatpush1.bf16.msra.mxu0 %v1422_v61  ;;  %1319 = vmatpush3.bf16.msra.mxu1 %v1506_v10 }
 0x61c   :  { %948 = vmatprep.subr.bf16.mxu0 %v1423_v7  ;;  %1320 = vmatprep.subr.bf16.mxu1 %v1424_v1 }
 0x61f   :  { %949 = vmatpush1.bf16.msra.mxu0 %v1494_v8  ;;  %1321 = vmatpush3.bf16.msra.mxu1 %v1525_v13  ;;  %v834_v8 = vunpack.c.l.bf16 %v1098_v2 }
 0x620   :  { %950 = vmatprep.subr.bf16.mxu0 %v1499_v9  ;;  %1322 = vmatprep.subr.bf16.mxu1 %v1424_v1 }
 0x623   :  { %951 = vmatpush1.bf16.msra.mxu0 %v1512_v11  ;;  %1323 = vmatpush3.bf16.msra.mxu1 %v1544_v16 }
 0x624   :  { %952 = vmatprep.subr.bf16.mxu0 %v1518_v12  ;;  %1324 = vmatprep.subr.bf16.mxu1 %v1424_v1 }
 0x627   :  { %953 = vmatpush1.bf16.msra.mxu0 %v1531_v14  ;;  %1325 = vmatpush3.bf16.msra.mxu1 %v1563_v19 }
 0x628   :  { %954 = vmatprep.subr.bf16.mxu0 %v1537_v15  ;;  %1326 = vmatprep.subr.bf16.mxu1 %v1424_v1 }
 0x62b   :  { %955 = vmatpush1.bf16.msra.mxu0 %v1551_v17  ;;  %1327 = vmatpush3.bf16.msra.mxu1 %v1582_v22 }
 0x62c   :  { %956 = vmatprep.subr.bf16.mxu0 %v1557_v18  ;;  %1328 = vmatprep.subr.bf16.mxu1 %v1424_v1 }
 0x62f   :  { %957 = vmatpush1.bf16.msra.mxu0 %v1570_v20  ;;  %1329 = vmatpush3.bf16.msra.mxu1 %v1596_v24 }
 0x630   :  { %958 = vmatprep.subr.bf16.mxu0 %v1576_v21  ;;  %1330 = vmatprep.subr.bf16.mxu1 %v1424_v1  ;;  %v835_v1 = vunpack.c.h.bf16 %v1098_v2 }
 0x633   :  { %959 = vmatpush1.bf16.msra.mxu0 %v1589_v23  ;;  %1331 = vmatpush3.bf16.msra.mxu1 %v1604_v25  ;;  %v836_v23 = vunpack.c.h.bf16 %v1907_v45 }
 0x6e9   :  { %v871_v9 = vpop.f32.mrb[24].mxu0  ;;  %v912_v10 = vpop.f32.mrb[24].mxu1 }
 0x6ea   :  { %v919_v11 = vadd.f32 %v871_v9, %v834_v8  ;;  %v873_v12 = vpop.f32.mrb[25].mxu0  ;;  %v1314_v13 = vpop.f32.mrb[25].mxu1  ;;  %v918_v24 = vadd.f32 %v1651_v41, %v912_v10 }
 0x6eb   :  { %v875_v14 = vpop.f32.mrb[26].mxu0  ;;  %v915_v15 = vpop.f32.mrb[26].mxu1  ;;  %v924_v19 = vadd.f32 %v873_v12, %v835_v1 }
 0x6ec   :  { %v920_v16 = vmul.f32 0.5, %v919_v11  ;;  %v876_v17 = vpop.f32.mrb[27].mxu0  ;;  %v1315_v18 = vpop.f32.mrb[27].mxu1 }
 0x6ed   :  { %v925_v20 = vmul.f32 0.5, %v924_v19 }
 0x6ee   :  { %1408 = vtanh.f32 %v920_v16 }
 0x6ef   :  { %1410 = vtanh.f32 %v925_v20 }
 0x6f8   :  { %v1409_v21 = vpop.eup %1408 }
 0x6f9   :  { %v922_v22 = vadd.f32 1.0, %v1409_v21  ;;  %v1411_v27 = vpop.eup %1410 }
 0x6fa   :  { %v927_v28 = vadd.f32 1.0, %v1411_v27 }
 0x6fb   :  { %v923_v25 = vmul.f32 0.5, %v922_v22 }
 0x6fc   :  { %v928_v30 = vmul.f32 0.5, %v927_v28 }
 0x6fd   :  { %v929_v63 = vmul.f32 %v923_v25, %v918_v24 }
 0x6ff   :  { %v930_v26 = vadd.f32 %v929_v63, %v836_v23 }
 0x701   :  { %1412 = vtanh.f32 %v930_v26 }
 0x70b   :  { %v1413_v29 = vpop.eup %1412 }
 0x70c   :  { %v932_v31 = vsub.f32 %v1912_v57, %v1413_v29 }
 0x70e   :  { %v933_v32 = vmul.f32 %v932_v31, %v928_v30 }
 0x710   :  { %v934_v3 = vadd.f32 %v1413_v29, %v933_v32 }
 0x712   :  { %v935_v4 = vpack.c.bf16 %v934_v3, %v934_v3 }
 0x714   :  { %1100 = vst [vmem:[%s1985_s3 + $0x18] sm:$0xf] %v935_v4  ;;  %977 = vmatmul.mubr.bf16.vlgmr.msra.gmra.mrb[28].mxu0 %v935_v4  ;;  %1333 = vmatmul.mubr.bf16.vlgmr.msra.gmra.mrb[28].mxu1 %v935_v4 }
 0x7e7   :  { %v978_v62 = vpop.f32.mrb[28].mxu0  ;;  %v1019_v33 = vpop.f32.mrb[28].mxu1 }
 0x7e8   :  { %v1026_v34 = vadd.f32 %v978_v62, %v941_v6  ;;  %v980_v35 = vpop.f32.mrb[29].mxu0  ;;  %v1334_v36 = vpop.f32.mrb[29].mxu1  ;;  %v1025_v49 = vadd.f32 %v1651_v41, %v1019_v33 }
 0x7e9   :  { %v982_v38 = vpop.f32.mrb[30].mxu0  ;;  %v1022_v39 = vpop.f32.mrb[30].mxu1  ;;  %v1031_v44 = vadd.f32 %v980_v35, %v942_v43 }
 0x7ea   :  { %v1027_v40 = vmul.f32 0.5, %v1026_v34  ;;  %v983_v42 = vpop.f32.mrb[31].mxu0  ;;  %v1335_v0 = vpop.f32.mrb[31].mxu1 }
 0x7eb   :  { %v1032_v45 = vmul.f32 0.5, %v1031_v44 }
 0x7ec   :  { %1414 = vtanh.f32 %v1027_v40 }
 0x7ed   :  { %1416 = vtanh.f32 %v1032_v45 }
 0x7f6   :  { %v1415_v46 = vpop.eup %1414 }
 0x7f7   :  { %v1029_v47 = vadd.f32 1.0, %v1415_v46  ;;  %v1417_v53 = vpop.eup %1416 }
 0x7f8   :  { %v1034_v54 = vadd.f32 1.0, %v1417_v53 }
 0x7f9   :  { %v1030_v50 = vmul.f32 0.5, %v1029_v47 }
 0x7fa   :  { %v1035_v56 = vmul.f32 0.5, %v1034_v54 }
 0x7fb   :  { %v1036_v51 = vmul.f32 %v1030_v50, %v1025_v49 }
 0x7fd   :  { %v1037_v52 = vadd.f32 %v1036_v51, %v943_v48 }
 0x7ff   :  { %1418 = vtanh.f32 %v1037_v52 }
 0x809   :  { %v1419_v55 = vpop.eup %1418 }
 0x80a   :  { %v1039_v57 = vsub.f32 %v934_v3, %v1419_v55 }
 0x80c   :  { %v1040_v58 = vmul.f32 %v1039_v57, %v1035_v56 }
 0x80e   :  { %v1041_v59 = vadd.f32 %v1419_v55, %v1040_v58 }
 0x810   :  { %v1042_v60 = vpack.c.bf16 %v1041_v59, %v1041_v59  ;;  %1049 = vst [vmem:[%s1986_s4] sm:$0xff] %v1041_v59 }
 0x812   :  { %1103 = vst [vmem:[%s1985_s3 + $0x1c] sm:$0xf] %v1042_v60 }

</bundles_post_ra>
